<compile_context>
chip_gen: v7x
topology: tpu7x:2x2x1
jax: 0.10.0
libtpu: 0.0.40
codegen_flags: <defaults>
</compile_context>

<pallas_src>
import functools
import math

import numpy as np
import jax
import jax.numpy as jnp
from jax import lax
from jax.experimental import pallas as pl
from jax.experimental.pallas import tpu as pltpu


def _pos_embed_kernel(consts_ref, o_ref, *, num_pos_feats):
    """Writes one row-tile (th, w, Cp) of the batch-invariant slab.

    consts_ref: (3, Cp) f32 rows [ky, kx, phase], Cp = 2F padded to a
    multiple of 128:
      ky[c]    = norm_scale_y / dim_t[c]       for c <  F, else 0
      kx[c]    = norm_scale_x / dim_t[c - F]   for F <= c < 2F, else 0
      phase[c] = 0 (even -> sin) or pi/2 (odd -> cos); 0 in the pad region.

    Channel c < F depends only on y, channel c >= F only on x, so
      out = where(c < F, sin(y*ky + ph), sin(x*kx + ph))
    with sin evaluated only on (th,1,Cp) and (1,w,Cp) vectors.
    """
    th, tw, cp = o_ref.shape
    row0 = pl.program_id(0) * th

    ky = consts_ref[0:1, :].reshape(1, 1, cp)
    kx = consts_ref[1:2, :].reshape(1, 1, cp)
    ph = consts_ref[2:3, :].reshape(1, 1, cp)

    # cumsum of an all-ones mask == index + 1.  int32 -> f32 is exact up to
    # 2**24, far beyond any realistic h, w.  Rows past h (ragged last block)
    # are computed but discarded by the masked output writeback.
    y = (lax.broadcasted_iota(jnp.int32, (th, 1, 1), 0)
         + (row0 + 1)).astype(jnp.float32)
    x = (lax.broadcasted_iota(jnp.int32, (1, tw, 1), 1)
         + 1).astype(jnp.float32)

    sin_y = jnp.sin(y * ky + ph)                       # (th, 1, Cp)
    sin_x = jnp.sin(x * kx + ph)                       # (1, tw, Cp)

    chan = lax.broadcasted_iota(jnp.int32, (1, 1, cp), 2)
    is_y = chan < num_pos_feats
    out = jnp.where(is_y,
                    jnp.broadcast_to(sin_y, (th, tw, cp)),
                    jnp.broadcast_to(sin_x, (th, tw, cp)))
    o_ref[...] = out.astype(o_ref.dtype)


def _choose_row_tile(h, w, cp, elem_bytes, target_bytes=8 << 20):
    """Fixed row tile near target_bytes; grid uses pl.cdiv (ragged last block).

    Capped at ceil(h/2) so the 'parallel' grid axis has >= 2 steps whenever h
    allows (lets v7x's two TensorCores both get work); rounded down to a
    multiple of 8 when possible.  8 MiB/block double-buffered (16 MiB) fits the
    32 MiB scoped-VMEM limit we request on every generation.
    """
    bytes_per_row = max(1, w * cp * elem_bytes)
    max_rows = max(1, target_bytes // bytes_per_row)
    half = -(-h // 2)                      # ceil(h / 2)
    th = int(min(max_rows, half, h))
    if th >= 8:
        th -= th % 8
    return max(1, th)


def position_embedding_sine(x, h, w, *, num_pos_feats=64, temperature=10000,
                            normalize=False, scale=None):
    """Returns pos of shape (n, h*w, 2*num_pos_feats), dtype = x.dtype.

    Matches PyTorch PositionEmbeddingSine.forward(x, h, w) (all-ones mask):
    pos.permute(0,3,1,2).flatten(2).transpose(1,2) layout, channels =
    [pos_y (F), pos_x (F)] with interleaved sin/cos.
    """
    if scale is not None and normalize is False:
        raise ValueError('normalize should be True if scale is passed')
    if scale is None:
        scale = 2 * math.pi

    n = x.shape[0]
    F = num_pos_feats
    two_f = 2 * F
    cp = max(128, ((two_f + 127) // 128) * 128)   # lane-dense padded channels
    dtype = x.dtype

    # --- trace-time per-channel constants (hoisted out of the kernel) -------
    m = np.arange(F, dtype=np.float64)
    dim_t = float(temperature) ** (2.0 * np.floor(m / 2.0) / float(F))
    inv_dim_t = 1.0 / dim_t
    if normalize:
        eps = 1e-6
        sy = float(scale) / (float(h) + eps)
        sx = float(scale) / (float(w) + eps)
    else:
        sy = sx = 1.0
    ky = np.zeros(cp, np.float64); ky[:F] = sy * inv_dim_t
    kx = np.zeros(cp, np.float64); kx[F:two_f] = sx * inv_dim_t
    # even channel within its half -> sin (phase 0); odd -> cos (phase pi/2).
    phase_half = np.where((np.arange(F) % 2) == 1, np.pi / 2.0, 0.0)
    ph = np.zeros(cp, np.float64); ph[:F] = phase_half; ph[F:two_f] = phase_half
    consts = jnp.asarray(np.stack([ky, kx, ph]), dtype=jnp.float32)  # (3, Cp)

    # --- row-tiled, batch-invariant pallas call ------------------------------
    elem_bytes = np.dtype(dtype).itemsize
    th = _choose_row_tile(h, w, cp, elem_bytes)
    grid = (pl.cdiv(h, th),)

    kernel = functools.partial(_pos_embed_kernel, num_pos_feats=F)
    pos_hw = pl.pallas_call(
        kernel,
        out_shape=jax.ShapeDtypeStruct((h, w, cp), dtype),
        grid=grid,
        in_specs=[pl.BlockSpec((3, cp), lambda i: (0, 0))],
        out_specs=pl.BlockSpec((th, w, cp), lambda i: (i, 0, 0)),
        compiler_params=pltpu.CompilerParams(
            dimension_semantics=("parallel",),
            vmem_limit_bytes=32 * 1024 * 1024),
    )(consts)

    if cp != two_f:                        # strip channel padding (F != 64)
        pos_hw = pos_hw[:, :, :two_f]

    # Pure layout glue: (h, w, 2F) -> (1, h*w, 2F).  The embedding is
    # batch-invariant; keep the batch dim as a broadcast so XLA can fuse it
    # into consumers instead of materializing n copies in HBM.
    pos = pos_hw.reshape(1, h * w, two_f)
    return jnp.broadcast_to(pos, (n, h * w, two_f))


def _reference(x, h, w, num_pos_feats=64, temperature=10000.0,
               normalize=False, scale=None):
    """Pure-jnp reference mirroring the PyTorch forward (all-ones mask)."""
    if scale is None:
        scale = 2 * math.pi
    n = x.shape[0]
    y_embed = jnp.broadcast_to(
        jnp.arange(1, h + 1, dtype=jnp.float32)[None, :, None], (n, h, w))
    x_embed = jnp.broadcast_to(
        jnp.arange(1, w + 1, dtype=jnp.float32)[None, None, :], (n, h, w))
    if normalize:
        eps = 1e-6
        y_embed = y_embed / (h + eps) * scale
        x_embed = x_embed / (w + eps) * scale
    dim_t = jnp.arange(num_pos_feats, dtype=jnp.float32)
    dim_t = temperature ** (2 * (dim_t // 2) / num_pos_feats)
    pos_x = x_embed[:, :, :, None] / dim_t
    pos_y = y_embed[:, :, :, None] / dim_t

    def interleave(p):
        s = jnp.sin(p[:, :, :, 0::2])
        c = jnp.cos(p[:, :, :, 1::2])
        return jnp.stack((s, c), axis=4).reshape(n, h, w, num_pos_feats)

    pos = jnp.concatenate((interleave(pos_y), interleave(pos_x)), axis=3)
    pos = pos.astype(x.dtype)
    return pos.reshape(n, h * w, 2 * num_pos_feats)


if __name__ == "__main__":
    key = jax.random.PRNGKey(0)
    n, ch, h, w = 2, 4, 16, 16
    num_pos_feats = 64

    # x is only consumed for batch size and dtype (as in the PyTorch module).
    x = jax.random.normal(key, (n, ch, h, w), dtype=jnp.float32)

    # normalize=False path
    pos = position_embedding_sine(x, h, w, num_pos_feats=num_pos_feats)
    pos = jax.block_until_ready(pos)
    assert pos.shape == (n, h * w, 2 * num_pos_feats), pos.shape
    assert pos.dtype == x.dtype
    ref = _reference(x, h, w, num_pos_feats=num_pos_feats)
    assert jnp.allclose(pos, ref, atol=1e-3, rtol=1e-3), \
        float(jnp.max(jnp.abs(pos - ref)))

    # normalize=True path
    pos_n = position_embedding_sine(x, h, w, num_pos_feats=num_pos_feats,
                                    normalize=True)
    pos_n = jax.block_until_ready(pos_n)
    ref_n = _reference(x, h, w, num_pos_feats=num_pos_feats, normalize=True)
    assert jnp.allclose(pos_n, ref_n, atol=1e-3, rtol=1e-3), \
        float(jnp.max(jnp.abs(pos_n - ref_n)))

    # ragged grid path (h not divisible by the row tile) + non-multiple-of-8 w
    h2, w2 = 13, 12
    pos_r = position_embedding_sine(x, h2, w2, num_pos_feats=num_pos_feats,
                                    normalize=True)
    pos_r = jax.block_until_ready(pos_r)
    ref_r = _reference(x, h2, w2, num_pos_feats=num_pos_feats, normalize=True)
    assert pos_r.shape == (n, h2 * w2, 2 * num_pos_feats), pos_r.shape
    assert jnp.allclose(pos_r, ref_r, atol=1e-3, rtol=1e-3), \
        float(jnp.max(jnp.abs(pos_r - ref_r)))

    print("KERNEL_OK")
</pallas_src>

<mosaic_0001>
module attributes {stable_mosaic.version = 11 : i64} {
  func.func @_pos_embed_kernel(%arg0: i32, %arg1: memref<3x128xf32, #tpu.memory_space<vmem>>, %arg2: memref<8x16x128xf32, #tpu.memory_space<vmem>>) attributes {dimension_semantics = [#tpu.dimension_semantics<parallel>], iteration_bounds = array<i64: 2>, scalar_prefetch = 0 : i64, scratch_operands = 0 : i64, tpu.core_type = #tpu.core_type<tc>, window_params = [{pipeline_mode = #tpu.pipeline_mode<synchronous>, transform_indices = @transform_0, window_bounds = array<i64: 3, 128>}, {transform_indices = @transform_1, window_bounds = array<i64: 8, 16, 128>}]} {
    %c8_i32 = arith.constant 8 : i32
    %0 = arith.muli %arg0, %c8_i32 : i32
    %c0 = arith.constant 0 : index
    %c0_0 = arith.constant 0 : index
    %1 = vector.load %arg1[%c0, %c0_0] : memref<3x128xf32, #tpu.memory_space<vmem>>, vector<1x128xf32>
    %2 = vector.shape_cast %1 : vector<1x128xf32> to vector<1x1x128xf32>
    %c1 = arith.constant 1 : index
    %c0_1 = arith.constant 0 : index
    %3 = vector.load %arg1[%c1, %c0_1] : memref<3x128xf32, #tpu.memory_space<vmem>>, vector<1x128xf32>
    %4 = vector.shape_cast %3 : vector<1x128xf32> to vector<1x1x128xf32>
    %c2 = arith.constant 2 : index
    %c0_2 = arith.constant 0 : index
    %5 = vector.load %arg1[%c2, %c0_2] : memref<3x128xf32, #tpu.memory_space<vmem>>, vector<1x128xf32>
    %6 = vector.shape_cast %5 : vector<1x128xf32> to vector<1x1x128xf32>
    %7 = tpu.iota {dimensions = array<i32: 0>} : vector<8x1x1xi32>
    %c1_i32 = arith.constant 1 : i32
    %8 = arith.addi %0, %c1_i32 : i32
    %9 = vector.broadcast %8 : i32 to vector<8x1x1xi32>
    %10 = arith.addi %7, %9 : vector<8x1x1xi32>
    %11 = arith.sitofp %10 : vector<8x1x1xi32> to vector<8x1x1xf32>
    %12 = tpu.iota {dimensions = array<i32: 1>} : vector<1x16x1xi32>
    %c1_i32_3 = arith.constant 1 : i32
    %13 = vector.broadcast %c1_i32_3 : i32 to vector<1x16x1xi32>
    %14 = arith.addi %12, %13 : vector<1x16x1xi32>
    %15 = arith.sitofp %14 : vector<1x16x1xi32> to vector<1x16x1xf32>
    %16 = vector.broadcast %11 : vector<8x1x1xf32> to vector<8x1x128xf32>
    %17 = vector.broadcast %2 : vector<1x1x128xf32> to vector<8x1x128xf32>
    %18 = arith.mulf %16, %17 : vector<8x1x128xf32>
    %19 = vector.broadcast %6 : vector<1x1x128xf32> to vector<8x1x128xf32>
    %20 = arith.addf %18, %19 : vector<8x1x128xf32>
    %21 = math.sin %20 : vector<8x1x128xf32>
    %22 = vector.broadcast %15 : vector<1x16x1xf32> to vector<1x16x128xf32>
    %23 = vector.broadcast %4 : vector<1x1x128xf32> to vector<1x16x128xf32>
    %24 = arith.mulf %22, %23 : vector<1x16x128xf32>
    %25 = vector.broadcast %6 : vector<1x1x128xf32> to vector<1x16x128xf32>
    %26 = arith.addf %24, %25 : vector<1x16x128xf32>
    %27 = math.sin %26 : vector<1x16x128xf32>
    %28 = tpu.iota {dimensions = array<i32: 2>} : vector<1x1x128xi32>
    %c64_i32 = arith.constant 64 : i32
    %29 = vector.broadcast %c64_i32 : i32 to vector<1x1x128xi32>
    %30 = arith.cmpi slt, %28, %29 : vector<1x1x128xi32>
    %31 = vector.shape_cast %21 : vector<8x1x128xf32> to vector<8x1x128xf32>
    %32 = vector.broadcast %31 : vector<8x1x128xf32> to vector<8x16x128xf32>
    %33 = vector.shape_cast %27 : vector<1x16x128xf32> to vector<1x16x128xf32>
    %34 = vector.broadcast %33 : vector<1x16x128xf32> to vector<8x16x128xf32>
    %35 = vector.shape_cast %30 : vector<1x1x128xi1> to vector<1x1x128xi1>
    %36 = vector.broadcast %35 : vector<1x1x128xi1> to vector<8x16x128xi1>
    %37 = arith.select %36, %32, %34 : vector<8x16x128xi1>, vector<8x16x128xf32>
    %c0_4 = arith.constant 0 : index
    %c0_5 = arith.constant 0 : index
    %c0_6 = arith.constant 0 : index
    %38 = vector.load %arg2[%c0_4, %c0_5, %c0_6] : memref<8x16x128xf32, #tpu.memory_space<vmem>>, vector<8x16x128xf32>
    tpu.vector_store %arg2[%c0_4, %c0_5, %c0_6], %37 {strides = array<i32>} : memref<8x16x128xf32, #tpu.memory_space<vmem>>, vector<8x16x128xf32>,
    return
  }
  func.func @transform_0(%arg0: i32) -> (i32, i32) {
    %c0_i32 = arith.constant 0 : i32
    %c0_i32_0 = arith.constant 0 : i32
    %c0_i32_1 = arith.constant 0 : i32
    return %c0_i32, %c0_i32_0 : i32, i32
  }
  func.func @transform_1(%arg0: i32) -> (i32, i32, i32) {
    %c0_i32 = arith.constant 0 : i32
    %c0_i32_0 = arith.constant 0 : i32
    %c0_i32_1 = arith.constant 0 : i32
    return %arg0, %c0_i32, %c0_i32_0 : i32, i32, i32
  }
}

</mosaic_0001>

<bundles_post_ra>
// kernel: tpu_custom_call.1
= control target key start
LH: loop header
LB: loop body
LE: loop exit
PB: predicated region body
PF: predicated region fallthrough
CT: control target
= control target key end

     0   :  { %6 = vsyncpa [#allocation3], 0  ;;  %s2734_s0 = inlined_call_operand.hbm [shape: f32[3,128], index: 0, kind: input, shape index: {}]   ;;  %s2735_s1 = inlined_call_operand.hbm [shape: f32[16,16,128], index: 1, kind: output, shape index: {}]  }
   0x1   :  { %7 = vsyncpa [#allocation4], 0 }
   0x2   :  { %9 = vsyncpa [#allocation4 + $0x1], 0  ;;  %s1663_s6 = smov 0   ;;  %s1665_s7 = smov 0  }
   0x3   :  { %s1667_s8 = smov 0   ;;  %s1669_s9 = smov 0  }
   0x4 LB: > { %s1684_s10 = sadd.s32 4294967295, %s1641_s9   ;;  %s1351_s11 = sadd.s32 4294967294, %s1641_s9   ;;  %s1641_s9 = sphi %s1669_s9, %s2769_s9   ;;  %s1637_s8 = sphi %s1667_s8, %s2768_s8   ;;  %s1633_s7 = sphi %s1665_s7, %s2767_s7   ;;  %s1629_s6 = sphi %s1663_s6, %s2766_s6  }
   0x5   : > { %s1688_s12 = sadd.s32 1, %s1641_s9   ;;  %s43_s13 = sadd.s32 1, %s1637_s8 }
   0x6   : > { %s40_s14 = ssub.s32 %s1641_s9, %s1688_s12  ;;  %p53_p0 = scmp.ne.s32.totalorder %s1637_s8, %s1633_s7 }
   0x7   : > { %p41_p1 = scmp.eq.s32.totalorder %s40_s14, 0  ;;  %p54_p2 = scmp.eq.s32.totalorder %s1684_s10, 1 }
   0x8   : > { %p59_p3 = scmp.ne.s32.totalorder %s1633_s7, %s1629_s6  ;;  %p60_p4 = scmp.eq.s32.totalorder %s1351_s11, 1 }
   0x9   : > { %s1699_s15 = scalar_select %p41_p1, %s1637_s8, %s43_s13  }
   0xa   : > { %p1701_p5 = por %p54_p2, %p53_p0  ;;  %p1705_p6 = por %p60_p4, %p59_p3 }
   0xb   : > { %p1352_p7 = scmp.ge.s32.totalorder %s1641_s9, 1  ;;  %p67_p8 = scmp.lt.s32.totalorder %s1641_s9, 3 }
   0xc   : > { %s2739_s16 = scalar_select %p1701_p5, 1, 0 }
   0xd   : > { %s2740_s17 = scalar_select %p1705_p6, 1, 0 }
   0xe   : > { %p2736_p9 = scmp.eq.s32.totalorder %s1684_s10, 0  ;;  %p1712_p10 = pnand %p1352_p7, %p67_p8 }
   0xf   : > { %s1643_s19 = smov [#allocation2]   ;;  %s1547_s24 = scalar_lea.hbm %s2734_s0, 64 }
  0x10   : > { %s2741_s18 = scalar_select %p1712_p10, 1, 0 }
  0x11   : > { %s80_s20 = sshll.u32 %s1643_s19, 4  ;;  %p1453_p11 = pneg %p1712_p10  ;;  %s81_s20 = int_to_ptr.vmem [resolvable:$true] %s80_s20 }
  0x12   : > { %p1548_p13 = scmp.ne.s32.totalorder %s2734_s0, %s1547_s24  ;;  %p1554_p3 = scmp.lt.u32.totalorder %s1547_s24, %s2734_s0 }
  0x13   : > { %p1720_p12 = pnand %p2736_p9, %p1453_p11 }
  0x15   : > { %p1549_p0 = pneg %p1720_p12 }
  0x17   : > { %p1550_p1 = pnand %p1549_p0, %p1548_p13 }
  0x19   : > { %p1551_p2 = pneg %p1550_p1 }
  0x1b   : > { %p1556_p4 = pnand %p1554_p3, %p1551_p2 }
  0x1d   : > { %1559 = shalt.err (!%p1556_p4)
}
  0x1e   : > { %s1560_s29 = scalar_lea.vmem %s81_s20, 64  ;;  %p1568_p9 = scmp.lt.s32.totalorder %s81_s20, %s81_s20 }
  0x1f   : > { %p1561_p7 = scmp.ne.s32.totalorder %s81_s20, %s1560_s29  ;;  %p1569_p6 = scmp.lt.s32.totalorder %s1560_s29, %s1560_s29 }
  0x21   : > { %p1563_p8 = pnand %p1561_p7, %p1549_p0  ;;  %p1570_p5 = por %p1569_p6, %p1568_p9 }
  0x23   : > { %p1564_p11 = pneg %p1563_p8 }
  0x25   : > { %p1571_p10 = pnand %p1570_p5, %p1564_p11 }
  0x27   : > { %1574 = shalt.err (!%p1571_p10)
}
  0x28   : > { %1456 = dma.hbm_to_vmem [thread:$0]  (!%p1720_p12), %s2734_s0, 64, %s81_s20, [#allocation3]  }
  0x29   : > { %p2743_p13 = scmp.ne.s32.totalorder %s2741_s18, 0 }
  0x2a   : > { %p2744_p1 = scmp.eq.s32.totalorder (!%p2743_p13), %s1684_s10, 0 }
  0x2b   : > { %93 = sbr.rel (%p2743_p13) target bundleno = 372 (0x174), region = 24 }
  0x32   : > { %1620 = dma.done.wait (%p2744_p1), [#allocation3], 64   ;;  %p2745_p0 = pmov %p2744_p1 }
  0x33   : > { %s1357_s3 = sshll.u32 %s1684_s10, 3  ;;  %v130_v0 = vlaneseq  ;;  %v1753_v9 = vld [vmem:[#allocation2] sm:$0x1]  ;;  %v1390_v10 = vld [vmem:[#allocation2 + $0x1] ss:$0 sm:$0xff]  ;;  %s105_s5 = sand.u32 1, %s1633_s7  }
  0x34   : > { %1622 = vsyncadd (%p2745_p0), [#allocation3], 4294967232  ;;  %s113_s4 = sadd.s32 1, %s1357_s3  ;;  %v1755_v11 = vld [vmem:[#allocation2 + $0x2] sm:$0x1]  ;;  %s1356_s11 = sshll.u32 %s105_s5, 7 }
  0x35   : > { %v131_v1 = vshrl.u32 %v130_v0, 7  ;;  %v1748_v2 = vstv %s113_s4  ;;  %v1644_v54 = vmov 683565275   ;;  %v1645_v56 = vmov 2475754826   ;;  %s2135_s13 = scalar_lea.vmem [#allocation5], %s1356_s11 }
  0x36   : > { %v122_v3 = vcvt.s32.f32 %v1748_v2  ;;  %v115_v23 = vadd.s32 1, %v1748_v2  ;;  %v1777_v30 = vadd.s32 2, %v1748_v2  ;;  %v1782_v40 = vadd.s32 3, %v1748_v2  ;;  %s1406_s14 = sshll.u32 %s1684_s10, 11  ;;  %s1289_s18 = sshll.u32 %s2135_s13, 4  ;;  %s2681_s18 = int_to_ptr.vmem [resolvable:$true] %s1289_s18 }
  0x37   : > { %v133_v4 = vadd.s32 1, %v131_v1  ;;  %v1751_v5 = vsub.s32 0, %v131_v1  ;;  %v132_v6 = vadd.s32 8, %v131_v1  ;;  %v1785_v41 = vadd.s32 4, %v1748_v2  ;;  %s2679_s21 = scalar_lea.hbm %s2735_s1, %s1406_s14  ;;  %s2693_s10 = scalar_lea.sflag [#allocation4], %s105_s5 }
  0x38   : > { %v137_v12 = vmul.f32 %v122_v3, %v1753_v9  ;;  %v123_v33 = vcvt.s32.f32 %v115_v23  ;;  %v124_v39 = vcvt.s32.f32 %v1777_v30  ;;  %v1646_v58 = vmov 2131351028   ;;  %s1575_s22 = scalar_lea.vmem %s2681_s18, 2048  ;;  %p2764_p6 = scmp.ne.s32.totalorder %s2739_s16, 0 }
  0x39   : > { %v135_v7 = vcvt.s32.f32 %v133_v4  ;;  %v134_v8 = vadd.s32 1, %v132_v6  ;;  %v994_v14 = vrot.slane %v1755_v11, %v1751_v5  ;;  %v1647_v60 = vmov 2102212464   ;;  %p1576_p5 = scmp.ne.s32.totalorder %s2681_s18, %s1575_s22  ;;  %s1650_s23 = smov [#allocation5]  }
  0x3a   : > { %v1761_v16 = vadd.f32 %v137_v12, %v1755_v11  ;;  %v1788_v44 = vmul.f32 %v123_v33, %v1753_v9  ;;  %v1648_v62 = vmov 920167782   ;;  %v1881_v30 = vand.u32 127, %v130_v0  ;;  %s1579_s24 = sshll.u32 %s1650_s23, 4  ;;  %s1580_s24 = int_to_ptr.vmem [resolvable:$false] %s1579_s24 }
  0x3b   : > { %v989_v13 = vmul.f32 %v1390_v10, %v135_v7  ;;  %v136_v15 = vcvt.s32.f32 %v134_v8  ;;  %p1577_p9 = pnand %p1576_p5, %p2764_p6  ;;  %s1581_s25 = scalar_lea.vmem %s1580_s24, 4096 }
  0x3c   : > { %v153_v19 = vand.u32 2147483647, %v1761_v16  ;;  %v156_v20 = vand.u32 2139095040, %v1761_v16  ;;  %vm155_vm13 = vcmp.lt.s32.totalorder %v1761_v16, 0  ;;  %p1582_p12 = scmp.lt.s32.totalorder %s2681_s18, %s1580_s24  ;;  %p1583_p2 = scmp.lt.s32.totalorder %s1581_s25, %s1575_s22 }
  0x3d   : > { %v1763_v17 = vadd.f32 %v994_v14, %v989_v13  ;;  %v990_v18 = vmul.f32 %v1390_v10, %v136_v15  ;;  %v1649_v10 = vmov 1326507024   ;;  %p1578_p10 = pneg %p1577_p9 }
  0x3e   : > { %v157_v24 = vshrl.u32 %v156_v20, 23  ;;  %v160_v26 = vand.u32 8388607, %v153_v19  ;;  %p1584_p3 = por %p1583_p2, %p1582_p12 }
  0x3f   : > { %v997_v21 = vand.u32 2147483647, %v1763_v17  ;;  %v1000_v22 = vand.u32 2139095040, %v1763_v17  ;;  %v1770_v25 = vadd.f32 %v994_v14, %v990_v18  ;;  %vm999_vm14 = vcmp.lt.s32.totalorder %v1763_v17, 0 }
  0x40   : > { %v1358_v29 = vadd.s32 4294967169, %v157_v24  ;;  %v161_v35 = vor.u32 8388608, %v160_v26  ;;  %p1585_p4 = pnand %p1584_p3, %p1578_p10 }
  0x41   : > { %v1001_v27 = vshrl.u32 %v1000_v22, 23  ;;  %v1004_v28 = vand.u32 8388607, %v997_v21  ;;  %v1104_v32 = vand.u32 2139095040, %v1770_v25  ;;  %v1101_v48 = vand.u32 2147483647, %v1770_v25 }
  0x42   : > { %v163_v34 = vadd.s32 1, %v1358_v29  ;;  %v1791_v49 = vshll.u32 %v161_v35, 8 }
  0x43   : > { %v1391_v31 = vadd.s32 4294967169, %v1001_v27  ;;  %v1005_v36 = vor.u32 8388608, %v1004_v28  ;;  %v1105_v38 = vshrl.u32 %v1104_v32, 23 }
  0x44   : > { %vm164_vm0 = vcmp.gt.s32.totalorder %v163_v34, 0 }
  0x45   : > { %v1007_v37 = vadd.s32 1, %v1391_v31  ;;  %v165_v42 = vsel %vm164_vm0, %v163_v34, 0  ;;  %v1395_v43 = vadd.s32 4294967169, %v1105_v38  ;;  %v1795_v52 = vshll.u32 %v1005_v36, 8 }
  0x46   : > { %v166_v45 = vshrl.u32 %v165_v42, 5  ;;  %v167_v46 = vand.u32 31, %v165_v42 }
  0x47   : > { %vm1008_vm1 = vcmp.gt.s32.totalorder %v1007_v37, 0  ;;  %v1802_v1 = vadd.s32 1, %v1395_v43 }
  0x48   : > { %v1009_v47 = vsel %vm1008_vm1, %v1007_v37, 0  ;;  %v168_v53 = vsub.s32 32, %v167_v46  ;;  %v170_v55 = vshll.u32 %v1644_v54, %v167_v46  ;;  %v173_v57 = vshll.u32 %v1645_v56, %v167_v46 }
  0x49   : > { %v1793_v50 = vshrl.u32 %v1009_v47, 5  ;;  %v1011_v51 = vand.u32 31, %v1009_v47  ;;  %v176_v59 = vshll.u32 %v1646_v58, %v167_v46  ;;  %v179_v61 = vshll.u32 %v1647_v60, %v167_v46 }
  0x4a   : > { %v182_v63 = vshll.u32 %v1648_v62, %v167_v46  ;;  %vm185_vm2 = vcmp.lt.s32.totalorder %v166_v45, 1  ;;  %v169_v3 = vshrl.u32 %v1644_v54, %v168_v53  ;;  %v171_v4 = vshrl.u32 %v1645_v56, %v168_v53 }
  0x4b   : > { %v174_v6 = vshrl.u32 %v1646_v58, %v168_v53  ;;  %v177_v7 = vshrl.u32 %v1647_v60, %v168_v53  ;;  %v180_v8 = vshrl.u32 %v1648_v62, %v168_v53  ;;  %v183_v12 = vshrl.u32 %v1649_v10, %v168_v53 }
  0x4c   : > { %vm186_vm3 = vcmp.lt.s32.totalorder %v166_v45, 2  ;;  %vm188_vm4 = vcmp.lt.s32.totalorder %v166_v45, 4  ;;  %v172_v13 = vor.u32 %v171_v4, %v170_v55  ;;  %v1012_v18 = vsub.s32 32, %v1011_v51 }
  0x4d   : > { %v175_v14 = vor.u32 %v174_v6, %v173_v57  ;;  %v178_v15 = vor.u32 %v177_v7, %v176_v59  ;;  %v181_v20 = vor.u32 %v180_v8, %v179_v61  ;;  %v184_v22 = vor.u32 %v183_v12, %v182_v63 }
  0x4e   : > { %vm187_vm5 = vcmp.lt.s32.totalorder %v166_v45, 3  ;;  %v1014_v23 = vshll.u32 %v1644_v54, %v1011_v51  ;;  %v189_v24 = vsel %vm185_vm2, %v169_v3, %v172_v13  ;;  %v1017_v33 = vshll.u32 %v1645_v56, %v1011_v51 }
  0x4f   : > { %v190_v26 = vsel %vm188_vm4, %v178_v15, 2102212464  ;;  %v193_v27 = vsel %vm185_vm2, %v172_v13, %v175_v14  ;;  %v197_v28 = vsel %vm185_vm2, %v175_v14, %v178_v15  ;;  %v194_v31 = vsel %vm188_vm4, %v181_v20, 920167782 }
  0x50   : > { %v191_v29 = vsel %vm187_vm5, %v175_v14, %v190_v26  ;;  %v198_v32 = vsel %vm188_vm4, %v184_v22, 1326507024  ;;  %v195_v34 = vsel %vm187_vm5, %v178_v15, %v194_v31  ;;  %v1013_v36 = vshrl.u32 %v1644_v54, %v1012_v18 }
  0x51   : > { %v199_v35 = vsel %vm187_vm5, %v181_v20, %v198_v32  ;;  %v1015_v37 = vshrl.u32 %v1645_v56, %v1012_v18  ;;  %v192_v38 = vsel %vm186_vm3, %v189_v24, %v191_v29  ;;  %v196_v42 = vsel %vm186_vm3, %v193_v27, %v195_v34 }
  0x52   : > { %v200_v43 = vsel %vm186_vm3, %v197_v28, %v199_v35  ;;  %v1018_v46 = vshrl.u32 %v1646_v58, %v1012_v18  ;;  %v1826_v55 = vmul.u32.u64.low %v1791_v49, %v196_v42  ;;  %v1827_v57 = vmul.u32.u64.high %v1791_v49, %v196_v42, %v1826_v55 }
  0x53   : > { %v1822_v47 = vmul.u32.u64.low %v1791_v49, %v200_v43  ;;  %v1823_v53 = vmul.u32.u64.high %v1791_v49, %v200_v43, %v1822_v47  ;;  %v1016_v59 = vor.u32 %v1015_v37, %v1014_v23  ;;  %v1020_v63 = vshll.u32 %v1646_v58, %v1011_v51 }
  0x54   : > { %v1019_v61 = vor.u32 %v1018_v46, %v1017_v33  ;;  %v1021_v3 = vshrl.u32 %v1647_v60, %v1012_v18  ;;  %v1023_v45 = vshll.u32 %v1647_v60, %v1011_v51  ;;  %v1024_v4 = vshrl.u32 %v1648_v62, %v1012_v18 }
  0x55   : > { %v1026_v6 = vshll.u32 %v1648_v62, %v1011_v51  ;;  %v1027_v7 = vshrl.u32 %v1649_v10, %v1012_v18  ;;  %v208_v8 = vmul.u32 %v1791_v49, %v192_v38  ;;  %vm1029_vm6 = vcmp.lt.s32.totalorder %v1793_v50, 1 }
  0x56   : > { %v1022_v12 = vor.u32 %v1021_v3, %v1020_v63  ;;  %vm1030_vm7 = vcmp.lt.s32.totalorder %v1793_v50, 2  ;;  %vm210_vm8 = vc.u32 %v1823_v53, %v1826_v55  ;;  %v211_v13 = vadd.s32 1, %v1827_v57 }
  0x57   : > { %v1025_v14 = vor.u32 %v1024_v4, %v1023_v45  ;;  %vm1031_vm9 = vcmp.lt.s32.totalorder %v1793_v50, 3  ;;  %v1028_v15 = vor.u32 %v1027_v7, %v1026_v6  ;;  %vm1032_vm10 = vcmp.lt.s32.totalorder %v1793_v50, 4 }
  0x58   : > { %v1033_v51 = vsel %vm1029_vm6, %v1013_v36, %v1016_v59  ;;  %v1037_v18 = vsel %vm1029_vm6, %v1016_v59, %v1019_v61  ;;  %v212_v49 = vsel %vm210_vm8, %v211_v13, %v1827_v57  ;;  %v1034_v20 = vsel %vm1032_vm10, %v1022_v12, 2102212464 }
  0x59   : > { %v1038_v22 = vsel %vm1032_vm10, %v1025_v14, 920167782  ;;  %v1041_v23 = vsel %vm1029_vm6, %v1019_v61, %v1022_v12  ;;  %v213_v24 = vadd.s32 %v212_v49, %v208_v8  ;;  %v1035_v26 = vsel %vm1031_vm9, %v1019_v61, %v1034_v20 }
  0x5a   : > { %v1039_v27 = vsel %vm1031_vm9, %v1022_v12, %v1038_v22  ;;  %v1042_v28 = vsel %vm1032_vm10, %v1028_v15, 1326507024  ;;  %v1036_v29 = vsel %vm1030_vm7, %v1033_v51, %v1035_v26  ;;  %vm1112_vm11 = vcmp.gt.s32.totalorder %v1802_v1, 0 }
  0x5b   : > { %v1040_v31 = vsel %vm1030_vm7, %v1037_v18, %v1039_v27  ;;  %v1043_v32 = vsel %vm1031_vm9, %v1025_v14, %v1042_v28  ;;  %v214_v33 = vadd.s32 536870912, %v213_v24  ;;  %v1113_v42 = vsel %vm1112_vm11, %v1802_v1, 0 }
  0x5c   : > { %v1044_v34 = vsel %vm1030_vm7, %v1041_v23, %v1043_v32  ;;  %v1853_v35 = vmul.u32.u64.low %v1795_v52, %v1040_v31  ;;  %v1854_v36 = vmul.u32.u64.high %v1795_v52, %v1040_v31, %v1853_v35  ;;  %v125_v43 = vcvt.s32.f32 %v1782_v40 }
  0x5d   : > { %v1858_v37 = vmul.u32.u64.low %v1795_v52, %v1044_v34  ;;  %v1859_v38 = vmul.u32.u64.high %v1795_v52, %v1044_v34, %v1858_v37  ;;  %v1863_v46 = vshrl.u32 %v214_v33, 30  ;;  %v1115_v47 = vand.u32 31, %v1113_v42 }
  0x5e   : > { %v139_v50 = vmul.f32 %v124_v39, %v1753_v9  ;;  %v126_v57 = vcvt.s32.f32 %v1785_v41  ;;  %v1052_v59 = vmul.u32 %v1795_v52, %v1036_v29  ;;  %v1108_v61 = vand.u32 8388607, %v1101_v48 }
  0x5f   : > { %v1874_v63 = vadd.f32 %v1788_v44, %v1755_v11  ;;  %v216_v40 = vshll.u32 %v1863_v46, 30  ;;  %v1055_v1 = vadd.s32 1, %v1854_v36  ;;  %vm1054_vm12 = vc.u32 %v1859_v38, %v1853_v35 }
  0x60   : > { %v1116_v39 = vsub.s32 32, %v1115_v47  ;;  %v1884_v41 = vmul.f32 %v125_v43, %v1753_v9  ;;  %v1890_v44 = vadd.f32 %v139_v50, %v1755_v11  ;;  %v1893_v45 = vmul.f32 %v126_v57, %v1753_v9 }
  0x61   : > { %v1886_v52 = vsub.s32 %v213_v24, %v216_v40  ;;  %v1056_v3 = vsel %vm1054_vm12, %v1055_v1, %v1854_v36  ;;  %v1109_v6 = vor.u32 8388608, %v1108_v61  ;;  %v257_v7 = vand.u32 2147483647, %v1874_v63 }
  0x62   : > { %v1057_v4 = vadd.s32 %v1056_v3, %v1052_v59  ;;  %v260_v0 = vand.u32 2139095040, %v1874_v63  ;;  %v1898_v12 = vshrl.u32 %v1113_v42, 5  ;;  %v1118_v13 = vshll.u32 %v1644_v54, %v1115_v47 }
  0x63   : > { %v219_v8 = vsub.s32 0, %v1886_v52  ;;  %v1121_v14 = vshll.u32 %v1645_v56, %v1115_v47  ;;  %v1119_v51 = vshrl.u32 %v1645_v56, %v1116_v39  ;;  %v1122_v9 = vshrl.u32 %v1646_v58, %v1116_v39 }
  0x64   : > { %v1058_v15 = vadd.s32 536870912, %v1057_v4  ;;  %v1124_v18 = vshll.u32 %v1646_v58, %v1115_v47  ;;  %v1125_v20 = vshrl.u32 %v1647_v60, %v1116_v39  ;;  %v1127_v22 = vshll.u32 %v1647_v60, %v1115_v47 }
  0x65   : > { %v1359_v49 = vmin.u32 %v219_v8, %v1886_v52  ;;  %v1128_v23 = vshrl.u32 %v1648_v62, %v1116_v39  ;;  %v1130_v26 = vshll.u32 %v1648_v62, %v1115_v47  ;;  %v1131_v27 = vshrl.u32 %v1649_v10, %v1116_v39 }
  0x66   : > { %v1059_v24 = vshrl.u32 %v1058_v15, 30  ;;  %v1911_v28 = vshll.u32 %v1109_v6, 8  ;;  %v209_v29 = vadd.s32 %v1826_v55, %v1823_v53  ;;  %v239_v32 = vsub.s32 4, %v1863_v46 }
  0x67   : > { %v221_v31 = vclz %v1359_v49  ;;  %v261_v33 = vshrl.u32 %v260_v0, 23  ;;  %v1117_v36 = vshrl.u32 %v1644_v54, %v1116_v39  ;;  %v1120_v37 = vor.u32 %v1119_v51, %v1118_v13 }
  0x68   : > { %v1060_v34 = vshll.u32 %v1059_v24, 30  ;;  %v1123_v42 = vor.u32 %v1122_v9, %v1121_v14  ;;  %v1126_v47 = vor.u32 %v1125_v20, %v1124_v18  ;;  %v1129_v50 = vor.u32 %v1128_v23, %v1127_v22 }
  0x69   : > { %v1360_v43 = vadd.s32 4294967294, %v221_v31  ;;  %vm1133_vm15 = vcmp.lt.s32.totalorder %v1898_v12, 1  ;;  %v1083_v59 = vsub.s32 4, %v1059_v24  ;;  %v1132_v53 = vor.u32 %v1131_v27, %v1130_v26 }
  0x6a   : > { %v1920_v57 = vsub.s32 %v1057_v4, %v1060_v34  ;;  %vm1136_vm0 = vcmp.lt.s32.totalorder %v1898_v12, 4  ;;  %vm1925_vm1 = vcmp.le.f32.partialorder %v153_v19, 0.7853982  ;;  %vm1134_vm3 = vcmp.lt.s32.totalorder %v1898_v12, 2 }
  0x6b   : > { %vm1361_vm2 = vcmp.lt.s32.totalorder %v1360_v43, 0  ;;  %vm1135_vm4 = vcmp.lt.s32.totalorder %v1898_v12, 3  ;;  %v1138_v61 = vsel %vm1136_vm0, %v1126_v47, 2102212464  ;;  %vm1935_vm5 = vcmp.le.f32.partialorder %v997_v21, 0.7853982 }
  0x6c   : > { %v224_v40 = vsel %vm1361_vm2, 0, %v1360_v43  ;;  %v1063_v19 = vsub.s32 0, %v1920_v57  ;;  %v1137_v39 = vsel %vm1133_vm15, %v1117_v36, %v1120_v37  ;;  %v1141_v3 = vsel %vm1133_vm15, %v1120_v37, %v1123_v42 }
  0x6d   : > { %v225_v4 = vsub.s32 32, %v224_v40  ;;  %v226_v6 = vshll.u32 %v1886_v52, %v224_v40  ;;  %v229_v0 = vsub.s32 4294967266, %v224_v40  ;;  %v1142_v8 = vsel %vm1136_vm0, %v1129_v50, 920167782 }
  0x6e   : > { %v1392_v21 = vmin.u32 %v1063_v19, %v1920_v57  ;;  %v1139_v13 = vsel %vm1135_vm4, %v1123_v42, %v1138_v61  ;;  %v1143_v14 = vsel %vm1135_vm4, %v1126_v47, %v1142_v8  ;;  %v1145_v15 = vsel %vm1133_vm15, %v1123_v42, %v1126_v47 }
  0x6f   : > { %v227_v51 = vshrl.u32 %v209_v29, %v225_v4  ;;  %v230_v9 = vadd.s32 127, %v229_v0  ;;  %v1144_v52 = vsel %vm1134_vm3, %v1141_v3, %v1143_v14  ;;  %v1146_v18 = vsel %vm1136_vm0, %v1132_v53, 1326507024 }
  0x70   : > { %v240_v49 = vsel %vm155_vm13, %v239_v32, %v1863_v46  ;;  %v1065_v20 = vclz %v1392_v21  ;;  %v1084_v22 = vsel %vm999_vm14, %v1083_v59, %v1059_v24  ;;  %v1362_v23 = vadd.s32 4294967169, %v261_v33 }
  0x71   : > { %v228_v26 = vor.u32 %v227_v51, %v226_v6  ;;  %v231_v27 = vshll.u32 %v230_v9, 23  ;;  %v1140_v29 = vsel %vm1134_vm3, %v1137_v39, %v1139_v13  ;;  %v1147_v31 = vsel %vm1135_vm4, %v1129_v50, %v1146_v18 }
  0x72   : > { %v1393_v34 = vadd.s32 4294967294, %v1065_v20  ;;  %v1148_v36 = vsel %vm1134_vm3, %v1145_v15, %v1147_v31  ;;  %v1970_v37 = vmul.u32.u64.low %v1911_v28, %v1144_v52  ;;  %v1971_v46 = vmul.u32.u64.high %v1911_v28, %v1144_v52, %v1970_v37 }
  0x73   : > { %v232_v32 = vor.u32 4788187, %v231_v27  ;;  %v235_v42 = vcvt.s32.f32 %v228_v26  ;;  %v1974_v24 = vmul.u32.u64.low %v1911_v28, %v1148_v36  ;;  %v1975_v33 = vmul.u32.u64.high %v1911_v28, %v1148_v36, %v1974_v24 }
  0x74   : > { %v242_v43 = vsel %vm1925_vm1, 0, %v240_v49  ;;  %v1053_v47 = vadd.s32 %v1853_v35, %v1859_v38  ;;  %vm1394_vm6 = vcmp.lt.s32.totalorder %v1393_v34, 0  ;;  %v267_v50 = vadd.s32 1, %v1362_v23 }
  0x75   : > { %v233_v12 = vand.u32 2147483647, %v232_v32  ;;  %v1068_v59 = vsel %vm1394_vm6, 0, %v1393_v34  ;;  %v1086_v53 = vsel %vm1935_vm5, 0, %v1084_v22  ;;  %v1156_v61 = vmul.u32 %v1911_v28, %v1140_v29 }
  0x76   : > { %v1069_v40 = vsub.s32 32, %v1068_v59  ;;  %v1070_v19 = vshll.u32 %v1920_v57, %v1068_v59  ;;  %v1073_v39 = vsub.s32 4294967266, %v1068_v59  ;;  %v1159_v3 = vadd.s32 1, %v1971_v46 }
  0x77   : > { %v236_v4 = vmul.f32 %v235_v42, %v233_v12  ;;  %v246_v6 = vadd.s32 3, %v242_v43  ;;  %vm1158_vm7 = vc.u32 %v1975_v33, %v1970_v37  ;;  %vm268_vm8 = vcmp.gt.s32.totalorder %v267_v50, 0 }
  0x78   : > { %v1071_v35 = vshrl.u32 %v1053_v47, %v1069_v40  ;;  %v1074_v38 = vadd.s32 127, %v1073_v39  ;;  %v1160_v0 = vsel %vm1158_vm7, %v1159_v3, %v1971_v46  ;;  %v269_v8 = vsel %vm268_vm8, %v267_v50, 0 }
  0x79   : > { %v237_v21 = vxor.u32 2147483648, %v236_v4  ;;  %v1090_v13 = vadd.s32 3, %v1086_v53  ;;  %v1161_v14 = vadd.s32 %v1160_v0, %v1156_v61  ;;  %v271_v28 = vand.u32 31, %v269_v8 }
  0x7a   : > { %v1072_v15 = vor.u32 %v1071_v35, %v1070_v19  ;;  %v1075_v51 = vshll.u32 %v1074_v38, 23  ;;  %v264_v57 = vand.u32 8388607, %v257_v7  ;;  %v361_v9 = vand.u32 2147483647, %v1890_v44 }
  0x7b   : > { %v238_v52 = vsel %vm155_vm13, %v237_v21, %v236_v4  ;;  %v1993_v18 = vand.u32 3, %v246_v6  ;;  %v1162_v49 = vadd.s32 536870912, %v1161_v14  ;;  %v272_v20 = vsub.s32 32, %v271_v28 }
  0x7c   : > { %v241_v22 = vsel %vm1925_vm1, %v1761_v16, %v238_v52  ;;  %v1076_v23 = vor.u32 4788187, %v1075_v51  ;;  %v1079_v26 = vcvt.s32.f32 %v1072_v15  ;;  %v364_v27 = vand.u32 2139095040, %v1890_v44 }
  0x7d   : > { %1505 = vcosq.f32 %v241_v22  ;;  %v1999_v29 = vand.u32 3, %v1090_v13  ;;  %v1163_v31 = vshrl.u32 %v1162_v49, 30  ;;  %v2001_v34 = vshrl.u32 %v269_v8, 5 }
  0x7e   : > { %1507 = vsinq.f32 %v241_v22  ;;  %v1077_v36 = vand.u32 2147483647, %v1076_v23  ;;  %v274_v46 = vshll.u32 %v1644_v54, %v271_v28  ;;  %v277_v32 = vshll.u32 %v1645_v56, %v271_v28 }
  0x7f   : > { %vm252_vm9 = vcmp.eq.s32.totalorder %v1993_v18, 2  ;;  %v1164_v55 = vshll.u32 %v1163_v31, 30  ;;  %v275_v42 = vshrl.u32 %v1645_v56, %v272_v20  ;;  %v278_v24 = vshrl.u32 %v1646_v58, %v272_v20 }
  0x80   : > { %v280_v43 = vshll.u32 %v1646_v58, %v271_v28  ;;  %vm249_vm10 = vcmp.eq.s32.totalorder %v1993_v18, 0  ;;  %v1080_v47 = vmul.f32 %v1079_v26, %v1077_v36  ;;  %vm1103_vm11 = vcmp.lt.s32.totalorder %v1770_v25, 0 }
  0x81   : > { %v281_v50 = vshrl.u32 %v1647_v60, %v272_v20  ;;  %v283_v12 = vshll.u32 %v1647_v60, %v271_v28  ;;  %v284_v59 = vshrl.u32 %v1648_v62, %v272_v20  ;;  %vm248_vm12 = vcmp.lt.s32.totalorder %v1993_v18, 2 }
  0x82   : > { %v2016_v53 = vadd.s32 %v1970_v37, %v1975_v33  ;;  %v2018_v61 = vsub.s32 %v1161_v14, %v1164_v55  ;;  %v265_v40 = vor.u32 8388608, %v264_v57  ;;  %v365_v19 = vshrl.u32 %v364_v27, 23 }
  0x83   : > { %v1081_v39 = vxor.u32 2147483648, %v1080_v47  ;;  %v285_v3 = vor.u32 %v284_v59, %v283_v12  ;;  %v286_v4 = vshll.u32 %v1648_v62, %v271_v28  ;;  %v287_v6 = vshrl.u32 %v1649_v10, %v272_v20 }
  0x84   : > { %vm245_vm13 = vweird.f32 %v1761_v16  ;;  %v1167_v35 = vsub.s32 0, %v2018_v61  ;;  %v1187_v38 = vsub.s32 4, %v1163_v31  ;;  %v273_v0 = vshrl.u32 %v1644_v54, %v272_v20 }
  0x85   : > { %v276_v8 = vor.u32 %v275_v42, %v274_v46  ;;  %v1082_v37 = vsel %vm999_vm14, %v1081_v39, %v1080_v47  ;;  %v279_v33 = vor.u32 %v278_v24, %v277_v32  ;;  %v282_v21 = vor.u32 %v281_v50, %v280_v43 }
  0x86   : > { %vm292_vm15 = vcmp.lt.s32.totalorder %v2001_v34, 4  ;;  %v1085_v13 = vsel %vm1935_vm5, %v1763_v17, %v1082_v37  ;;  %v1396_v14 = vmin.u32 %v1167_v35, %v2018_v61  ;;  %vm289_vm0 = vcmp.lt.s32.totalorder %v2001_v34, 1 }
  0x87   : > { %vm291_vm1 = vcmp.lt.s32.totalorder %v2001_v34, 3  ;;  %1509 = vcosq.f32 %v1085_v13  ;;  %v288_v28 = vor.u32 %v287_v6, %v286_v4  ;;  %v298_v15 = vsel %vm292_vm15, %v285_v3, 920167782  ;;  %v1506_v57 = vpop.eup %1505 }
  0x88   : > { %v2036_v51 = vshll.u32 %v265_v40, 8  ;;  %1511 = vsinq.f32 %v1085_v13  ;;  %vm2040_vm14 = vcmp.le.f32.partialorder %v1101_v48, 0.7853982  ;;  %v1169_v52 = vclz %v1396_v14  ;;  %v1508_v22 = vpop.eup %1507 }
  0x89   : > { %v294_v49 = vsel %vm292_vm15, %v282_v21, 2102212464  ;;  %v1366_v20 = vadd.s32 4294967169, %v365_v19  ;;  %v253_v23 = vxor.u32 2147483648, %v1506_v57  ;;  %vm290_vm2 = vcmp.lt.s32.totalorder %v2001_v34, 2 }
  0x8a   : > { %v297_v26 = vsel %vm289_vm0, %v276_v8, %v279_v33  ;;  %v299_v27 = vsel %vm291_vm1, %v282_v21, %v298_v15  ;;  %v250_v36 = vxor.u32 2147483648, %v1508_v22  ;;  %vm1093_vm3 = vcmp.eq.s32.totalorder %v1999_v29, 0 }
  0x8b   : > { %v1397_v48 = vadd.s32 4294967294, %v1169_v52  ;;  %v2054_v46 = vsel %vm1103_vm11, %v1187_v38, %v1163_v31  ;;  %v293_v32 = vsel %vm289_vm0, %v273_v0, %v276_v8  ;;  %v254_v55 = vsel %vm252_vm9, %v253_v23, %v1508_v22 }
  0x8c   : > { %vm1092_vm4 = vcmp.lt.s32.totalorder %v1999_v29, 2  ;;  %v295_v42 = vsel %vm291_vm1, %v279_v33, %v294_v49  ;;  %v301_v24 = vsel %vm289_vm0, %v279_v33, %v282_v21  ;;  %v302_v43 = vsel %vm292_vm15, %v288_v28, 1326507024 }
  0x8d   : > { %v251_v31 = vsel %vm249_vm10, %v1506_v57, %v250_v36  ;;  %vm1089_vm5 = vweird.f32 %v1763_v17  ;;  %vm1398_vm6 = vcmp.lt.s32.totalorder %v1397_v48, 0  ;;  %v300_v47 = vsel %vm290_vm2, %v297_v26, %v299_v27 }
  0x8e   : > { %v303_v50 = vsel %vm291_vm1, %v285_v3, %v302_v43  ;;  %v255_v12 = vsel %vm248_vm12, %v251_v31, %v254_v55  ;;  %vm1207_vm7 = vcmp.lt.s32.totalorder %v1881_v30, 64  ;;  %v1172_v59 = vsel %vm1398_vm6, 0, %v1397_v48 }
  0x8f   : > { %v304_v40 = vsel %vm290_vm2, %v301_v24, %v303_v50  ;;  %v371_v19 = vadd.s32 1, %v1366_v20  ;;  %v1173_v39 = vsub.s32 32, %v1172_v59  ;;  %v1174_v4 = vshll.u32 %v2018_v61, %v1172_v59 }
  0x90   : > { %v1177_v6 = vsub.s32 4294967266, %v1172_v59  ;;  %v296_v35 = vsel %vm290_vm2, %v293_v32, %v295_v42  ;;  %v256_v3 = vsel %vm245_vm13, nan, %v255_v12  ;;  %vm1096_vm9 = vcmp.eq.s32.totalorder %v1999_v29, 2 }
  0x91   : > { %v2085_v18 = vmul.u32.u64.low %v2036_v51, %v304_v40  ;;  %v2086_v38 = vmul.u32.u64.high %v2036_v51, %v304_v40, %v2085_v18  ;;  %vm372_vm8 = vcmp.gt.s32.totalorder %v371_v19, 0  ;;  %v1175_v0 = vshrl.u32 %v2016_v53, %v1173_v39  ;;  %v1510_v34 = vpop.eup %1509 }
  0x92   : > { %v1178_v8 = vadd.s32 127, %v1177_v6  ;;  %v2091_v37 = vmul.u32.u64.low %v2036_v51, %v300_v47  ;;  %v2092_v61 = vmul.u32.u64.high %v2036_v51, %v300_v47, %v2091_v37  ;;  %v1190_v16 = vsel %vm2040_vm14, 0, %v2054_v46  ;;  %v1512_v13 = vpop.eup %1511 }
  0x93   : > { %v2101_v33 = vand.u32 8388607, %v361_v9  ;;  %v373_v21 = vsel %vm372_vm8, %v371_v19, 0  ;;  %v1097_v53 = vxor.u32 2147483648, %v1510_v34  ;;  %v1176_v14 = vor.u32 %v1175_v0, %v1174_v4 }
  0x94   : > { %v1179_v28 = vshll.u32 %v1178_v8, 23  ;;  %v312_v15 = vmul.u32 %v2036_v51, %v296_v35  ;;  %v1094_v57 = vxor.u32 2147483648, %v1512_v13  ;;  %v2107_v52 = vrot.slane %v256_v3, %v1751_v5 }
  0x95   : > { %vm314_vm10 = vc.u32 %v2086_v38, %v2091_v37  ;;  %v375_v49 = vand.u32 31, %v373_v21  ;;  %v1098_v20 = vsel %vm1096_vm9, %v1097_v53, %v1512_v13  ;;  %v1183_v23 = vcvt.s32.f32 %v1176_v14 }
  0x96   : > { %v1180_v22 = vor.u32 4788187, %v1179_v28  ;;  %v315_v26 = vadd.s32 1, %v2092_v61  ;;  %v1095_v51 = vsel %vm1093_vm3, %v1510_v34, %v1094_v57  ;;  %v2116_v27 = vshrl.u32 %v373_v21, 5 }
  0x97   : > { %v376_v36 = vsub.s32 32, %v375_v49  ;;  %v378_v48 = vshll.u32 %v1644_v54, %v375_v49  ;;  %v1099_v46 = vsel %vm1092_vm4, %v1095_v51, %v1098_v20  ;;  %v381_v42 = vshll.u32 %v1645_v56, %v375_v49 }
  0x98   : > { %v1181_v32 = vand.u32 2147483647, %v1180_v22  ;;  %v316_v55 = vsel %vm314_vm10, %v315_v26, %v2092_v61  ;;  %v2125_v24 = vsel %vm1089_vm5, nan, %v1099_v46  ;;  %v384_v47 = vshll.u32 %v1646_v58, %v375_v49 }
  0x99   : > { %v317_v43 = vadd.s32 %v316_v55, %v312_v15  ;;  %v379_v31 = vshrl.u32 %v1645_v56, %v376_v36  ;;  %v1242_v29 = vsel %vm1207_vm7, %v2107_v52, %v2125_v24  ;;  %v382_v12 = vshrl.u32 %v1646_v58, %v376_v36 }
  0x9a   : > { %v1184_v50 = vmul.f32 %v1183_v23, %v1181_v32  ;;  %v385_v59 = vshrl.u32 %v1647_v60, %v376_v36  ;;  %1258 = vst [vmem:[%s2135_s13] sm:$0xff] %v1242_v29  ;;  %v387_v40 = vshll.u32 %v1647_v60, %v375_v49  ;;  %v388_v19 = vshrl.u32 %v1648_v62, %v376_v36 }
  0x9b   : > { %v318_v17 = vadd.s32 536870912, %v317_v43  ;;  %v2142_v39 = vadd.f32 %v1884_v41, %v1755_v11  ;;  %v1194_v6 = vadd.s32 3, %v1190_v16  ;;  %v369_v35 = vor.u32 8388608, %v2101_v33 }
  0x9c   : > { %v1185_v4 = vxor.u32 2147483648, %v1184_v50  ;;  %v390_v3 = vshll.u32 %v1648_v62, %v375_v49  ;;  %v380_v0 = vor.u32 %v379_v31, %v378_v48  ;;  %v383_v8 = vor.u32 %v382_v12, %v381_v42 }
  0x9d   : > { %v319_v18 = vshrl.u32 %v318_v17, 30  ;;  %v391_v61 = vshrl.u32 %v1649_v10, %v376_v36  ;;  %v386_v21 = vor.u32 %v385_v59, %v384_v47  ;;  %v389_v13 = vor.u32 %v388_v19, %v387_v40 }
  0x9e   : > { %v1186_v34 = vsel %vm1103_vm11, %v1185_v4, %v1184_v50  ;;  %vm393_vm12 = vcmp.lt.s32.totalorder %v2116_v27, 1  ;;  %vm396_vm13 = vcmp.lt.s32.totalorder %v2116_v27, 4  ;;  %v377_v53 = vshrl.u32 %v1644_v54, %v376_v36 }
  0x9f   : > { %v1189_v41 = vsel %vm2040_vm14, %v1770_v25, %v1186_v34  ;;  %v320_v16 = vshll.u32 %v319_v18, 30  ;;  %v392_v33 = vor.u32 %v391_v61, %v390_v3  ;;  %vm394_vm15 = vcmp.lt.s32.totalorder %v2116_v27, 2 }
  0xa0   : > { %1513 = vcosq.f32 %v1189_v41  ;;  %vm395_vm0 = vcmp.lt.s32.totalorder %v2116_v27, 3  ;;  %v398_v28 = vsel %vm396_vm13, %v386_v21, 2102212464  ;;  %v401_v1 = vsel %vm393_vm12, %v380_v0, %v383_v8 }
  0xa1   : > { %1515 = vsinq.f32 %v1189_v41  ;;  %v2157_v14 = vsub.s32 %v317_v43, %v320_v16  ;;  %v1195_v15 = vand.u32 3, %v1194_v6  ;;  %v402_v57 = vsel %vm396_vm13, %v389_v13, 920167782 }
  0xa2   : > { %v405_v49 = vsel %vm393_vm12, %v383_v8, %v386_v21  ;;  %v409_v20 = vshll.u32 %v369_v35, 8  ;;  %v343_v23 = vsub.s32 4, %v319_v18  ;;  %v403_v26 = vsel %vm395_vm0, %v386_v21, %v402_v57 }
  0xa3   : > { %v323_v22 = vsub.s32 0, %v2157_v14  ;;  %v406_v51 = vsel %vm396_vm13, %v392_v33, 1326507024  ;;  %v397_v36 = vsel %vm393_vm12, %v377_v53, %v380_v0  ;;  %v399_v48 = vsel %vm395_vm0, %v383_v8, %v398_v28 }
  0xa4   : > { %v404_v46 = vsel %vm394_vm15, %v401_v1, %v403_v26  ;;  %v407_v32 = vsel %vm395_vm0, %v389_v13, %v406_v51  ;;  %vm259_vm11 = vcmp.lt.s32.totalorder %v1874_v63, 0  ;;  %v2186_v43 = vadd.f32 %v1893_v45, %v1755_v11 }
  0xa5   : > { %v1363_v55 = vmin.u32 %v323_v22, %v2157_v14  ;;  %v408_v42 = vsel %vm394_vm15, %v405_v49, %v407_v32  ;;  %v2191_v29 = vmul.u32.u64.low %v409_v20, %v404_v46  ;;  %v2192_v50 = vmul.u32.u64.high %v409_v20, %v404_v46, %v2191_v29 }
  0xa6   : > { %v2188_v31 = vmul.u32.u64.low %v409_v20, %v408_v42  ;;  %v2189_v47 = vmul.u32.u64.high %v409_v20, %v408_v42, %v2188_v31  ;;  %vm1193_vm1 = vweird.f32 %v1770_v25  ;;  %v400_v59 = vsel %vm394_vm15, %v397_v36, %v399_v48 }
  0xa7   : > { %v325_v12 = vclz %v1363_v55  ;;  %v465_v17 = vand.u32 2147483647, %v2142_v39  ;;  %vm1196_vm14 = vcmp.lt.s32.totalorder %v1195_v15, 2  ;;  %vm2200_vm2 = vcmp.le.f32.partialorder %v257_v7, 0.7853982 }
  0xa8   : > { %v344_v45 = vsel %vm259_vm11, %v343_v23, %v319_v18  ;;  %v468_v40 = vand.u32 2139095040, %v2142_v39  ;;  %vm1197_vm3 = vcmp.eq.s32.totalorder %v1195_v15, 0  ;;  %vm1200_vm4 = vcmp.eq.s32.totalorder %v1195_v15, 2 }
  0xa9   : > { %v313_v27 = vadd.s32 %v2091_v37, %v2086_v38  ;;  %v1364_v19 = vadd.s32 4294967294, %v325_v12  ;;  %v416_v6 = vmul.u32 %v409_v20, %v400_v59  ;;  %vm418_vm5 = vc.u32 %v2189_v47, %v2191_v29 }
  0xaa   : > { %v1514_v4 = vpop.eup %1513  ;;  %v419_v7 = vadd.s32 1, %v2192_v50  ;;  %v469_v35 = vshrl.u32 %v468_v40, 23  ;;  %v346_v18 = vsel %vm2200_vm2, 0, %v344_v45  ;;  %v472_v8 = vand.u32 8388607, %v465_v17 }
  0xab   : > { %v1516_v3 = vpop.eup %1515  ;;  %v1201_v0 = vxor.u32 2147483648, %v1514_v4  ;;  %vm1365_vm6 = vcmp.lt.s32.totalorder %v1364_v19, 0  ;;  %v350_v53 = vadd.s32 3, %v346_v18  ;;  %v572_v22 = vand.u32 2139095040, %v2186_v43 }
  0xac   : > { %v1198_v61 = vxor.u32 2147483648, %v1516_v3  ;;  %v328_v34 = vsel %vm1365_vm6, 0, %v1364_v19  ;;  %v420_v38 = vsel %vm418_vm5, %v419_v7, %v2192_v50  ;;  %v1370_v37 = vadd.s32 4294967169, %v469_v35 }
  0xad   : > { %v1202_v21 = vsel %vm1200_vm4, %v1201_v0, %v1516_v3  ;;  %v329_v13 = vsub.s32 32, %v328_v34  ;;  %v330_v41 = vshll.u32 %v2157_v14, %v328_v34  ;;  %v333_v16 = vsub.s32 4294967266, %v328_v34 }
  0xae   : > { %v1199_v33 = vsel %vm1197_vm3, %v1514_v4, %v1198_v61  ;;  %v421_v28 = vadd.s32 %v420_v38, %v416_v6  ;;  %v475_v1 = vadd.s32 1, %v1370_v37  ;;  %v473_v51 = vor.u32 8388608, %v472_v8 }
  0xaf   : > { %v1203_v57 = vsel %vm1196_vm14, %v1199_v33, %v1202_v21  ;;  %v331_v49 = vshrl.u32 %v313_v27, %v329_v13  ;;  %v334_v20 = vadd.s32 127, %v333_v16  ;;  %v2230_v31 = vand.u32 3, %v350_v53 }
  0xb0   : > { %v2223_v23 = vsel %vm1193_vm1, nan, %v1203_v57  ;;  %v422_v26 = vadd.s32 536870912, %v421_v28  ;;  %vm476_vm8 = vcmp.gt.s32.totalorder %v475_v1, 0  ;;  %v2233_v25 = vadd.s32 %v2191_v29, %v2189_v47 }
  0xb1   : > { %v1243_v14 = vsel %vm1207_vm7, %v2107_v52, %v2223_v23  ;;  %v332_v36 = vor.u32 %v331_v49, %v330_v41  ;;  %v335_v48 = vshll.u32 %v334_v20, 23  ;;  %v477_v15 = vsel %vm476_vm8, %v475_v1, 0 }
  0xb2   : > { %1259 = vst [vmem:[%s2135_s13 + $0x8] sm:$0xff] %v1243_v14  ;;  %v423_v46 = vshrl.u32 %v422_v26, 30  ;;  %v479_v32 = vand.u32 31, %v477_v15  ;;  %v569_v59 = vand.u32 2147483647, %v2186_v43  ;;  %v2237_v40 = vshll.u32 %v473_v51, 8 }
  0xb3   : > { %v336_v55 = vor.u32 4788187, %v335_v48  ;;  %v339_v42 = vcvt.s32.f32 %v332_v36  ;;  %v573_v27 = vshrl.u32 %v572_v22, 23  ;;  %vm363_vm9 = vcmp.lt.s32.totalorder %v1890_v44, 0 }
  0xb4   : > { %v424_v50 = vshll.u32 %v423_v46, 30  ;;  %v480_v12 = vsub.s32 32, %v479_v32  ;;  %v482_v52 = vshll.u32 %v1644_v54, %v479_v32  ;;  %v485_v6 = vshll.u32 %v1645_v56, %v479_v32 }
  0xb5   : > { %v337_v45 = vand.u32 2147483647, %v336_v55  ;;  %v488_v7 = vshll.u32 %v1646_v58, %v479_v32  ;;  %v491_v3 = vshll.u32 %v1647_v60, %v479_v32  ;;  %v478_v18 = vshrl.u32 %v477_v15, 5 }
  0xb6   : > { %v2239_v19 = vsub.s32 %v421_v28, %v424_v50  ;;  %v483_v4 = vshrl.u32 %v1645_v56, %v480_v12  ;;  %v486_v29 = vshrl.u32 %v1646_v58, %v480_v12  ;;  %v489_v35 = vshrl.u32 %v1647_v60, %v480_v12 }
  0xb7   : > { %v340_v47 = vmul.f32 %v339_v42, %v337_v45  ;;  %v492_v8 = vshrl.u32 %v1648_v62, %v480_v12  ;;  %v2252_v61 = vand.u32 8388607, %v569_v59  ;;  %v447_v38 = vsub.s32 4, %v423_v46 }
  0xb8   : > { %v427_v0 = vsub.s32 0, %v2239_v19  ;;  %v494_v37 = vshll.u32 %v1648_v62, %v479_v32  ;;  %v1374_v21 = vadd.s32 4294967169, %v573_v27  ;;  %v481_v41 = vshrl.u32 %v1644_v54, %v480_v12 }
  0xb9   : > { %v341_v34 = vxor.u32 2147483648, %v340_v47  ;;  %v484_v16 = vor.u32 %v483_v4, %v482_v52  ;;  %v495_v33 = vshrl.u32 %v1649_v10, %v480_v12  ;;  %v487_v28 = vor.u32 %v486_v29, %v485_v6 }
  0xba   : > { %v1367_v13 = vmin.u32 %v427_v0, %v2239_v19  ;;  %v490_v1 = vor.u32 %v489_v35, %v488_v7  ;;  %v493_v57 = vor.u32 %v492_v8, %v491_v3  ;;  %vm2265_vm10 = vcmp.le.f32.partialorder %v361_v9, 0.7853982 }
  0xbb   : > { %v342_v53 = vsel %vm259_vm11, %v341_v34, %v340_v47  ;;  %vm497_vm12 = vcmp.lt.s32.totalorder %v478_v18, 1  ;;  %vm498_vm13 = vcmp.lt.s32.totalorder %v478_v18, 2  ;;  %v496_v26 = vor.u32 %v495_v33, %v494_v37 }
  0xbc   : > { %v345_v49 = vsel %vm2200_vm2, %v1874_v63, %v342_v53  ;;  %v429_v22 = vclz %v1367_v13  ;;  %vm499_vm15 = vcmp.lt.s32.totalorder %v478_v18, 3  ;;  %vm500_vm0 = vcmp.lt.s32.totalorder %v478_v18, 4 }
  0xbd   : > { %1517 = vcosq.f32 %v345_v49  ;;  %v501_v14 = vsel %vm497_vm12, %v481_v41, %v484_v16  ;;  %v502_v36 = vsel %vm500_vm0, %v490_v1, 2102212464  ;;  %v505_v48 = vsel %vm497_vm12, %v484_v16, %v487_v28 }
  0xbe   : > { %1519 = vsinq.f32 %v345_v49  ;;  %v1368_v51 = vadd.s32 4294967294, %v429_v22  ;;  %v503_v11 = vsel %vm499_vm15, %v487_v28, %v502_v36  ;;  %v506_v15 = vsel %vm500_vm0, %v493_v57, 920167782 }
  0xbf   : > { %v509_v32 = vsel %vm497_vm12, %v487_v28, %v490_v1  ;;  %v448_v9 = vsel %vm363_vm9, %v447_v38, %v423_v46  ;;  %v507_v55 = vsel %vm499_vm15, %v490_v1, %v506_v15  ;;  %v510_v42 = vsel %vm500_vm0, %v496_v26, 1326507024 }
  0xc0   : > { %vm1369_vm11 = vcmp.lt.s32.totalorder %v1368_v51, 0  ;;  %v504_v12 = vsel %vm498_vm13, %v501_v14, %v503_v11  ;;  %v508_v45 = vsel %vm498_vm13, %v505_v48, %v507_v55  ;;  %v511_v52 = vsel %vm499_vm15, %v493_v57, %v510_v42 }
  0xc1   : > { %v432_v50 = vsel %vm1369_vm11, 0, %v1368_v51  ;;  %vm349_vm1 = vweird.f32 %v1874_v63  ;;  %v512_v7 = vsel %vm498_vm13, %v509_v32, %v511_v52  ;;  %vm352_vm14 = vcmp.lt.s32.totalorder %v2230_v31, 2 }
  0xc2   : > { %v433_v27 = vsub.s32 32, %v432_v50  ;;  %v434_v4 = vshll.u32 %v2239_v19, %v432_v50  ;;  %v437_v6 = vsub.s32 4294967266, %v432_v50  ;;  %v579_v8 = vadd.s32 1, %v1374_v21 }
  0xc3   : > { %v2280_v46 = vmul.u32.u64.low %v2237_v40, %v512_v7  ;;  %v2281_v47 = vmul.u32.u64.high %v2237_v40, %v512_v7, %v2280_v46  ;;  %v2284_v29 = vmul.u32.u64.low %v2237_v40, %v508_v45  ;;  %v2285_v35 = vmul.u32.u64.high %v2237_v40, %v508_v45, %v2284_v29 }
  0xc4   : > { %v435_v3 = vshrl.u32 %v2233_v25, %v433_v27  ;;  %v438_v0 = vadd.s32 127, %v437_v6  ;;  %vm353_vm2 = vcmp.eq.s32.totalorder %v2230_v31, 0  ;;  %vm356_vm3 = vcmp.eq.s32.totalorder %v2230_v31, 2 }
  0xc5   : > { %v450_v19 = vsel %vm2265_vm10, 0, %v448_v9  ;;  %v119_v18 = vadd.s32 5, %v1748_v2  ;;  %v520_v37 = vmul.u32 %v2237_v40, %v504_v12  ;;  %vm580_vm4 = vcmp.gt.s32.totalorder %v579_v8, 0 }
  0xc6   : > { %v436_v34 = vor.u32 %v435_v3, %v434_v4  ;;  %v439_v38 = vshll.u32 %v438_v0, 23  ;;  %vm522_vm5 = vc.u32 %v2281_v47, %v2284_v29  ;;  %v523_v25 = vadd.s32 1, %v2285_v35 }
  0xc7   : > { %v1518_v13 = vpop.eup %1517  ;;  %v577_v21 = vor.u32 8388608, %v2252_v61  ;;  %v581_v41 = vsel %vm580_vm4, %v579_v8, 0  ;;  %v454_v49 = vadd.s32 3, %v450_v19  ;;  %v127_v36 = vcvt.s32.f32 %v119_v18 }
  0xc8   : > { %v1520_v16 = vpop.eup %1519  ;;  %v357_v33 = vxor.u32 2147483648, %v1518_v13  ;;  %v440_v53 = vor.u32 4788187, %v439_v38  ;;  %v443_v28 = vcvt.s32.f32 %v436_v34  ;;  %v2300_v1 = vshrl.u32 %v581_v41, 5 }
  0xc9   : > { %v354_v57 = vxor.u32 2147483648, %v1520_v16  ;;  %v524_v40 = vsel %vm522_vm5, %v523_v25, %v2285_v35  ;;  %v583_v22 = vand.u32 31, %v581_v41  ;;  %v455_v41 = vand.u32 3, %v454_v49 }
  0xca   : > { %v358_v26 = vsel %vm356_vm3, %v357_v33, %v1520_v16  ;;  %v441_v51 = vand.u32 2147483647, %v440_v53  ;;  %v525_v14 = vadd.s32 %v524_v40, %v520_v37  ;;  %vm601_vm6 = vcmp.lt.s32.totalorder %v2300_v1, 1  ;;  %v2341_v33 = vld [vmem:[#allocation2] sm:$0x1] }
  0xcb   : > { %v355_v61 = vsel %vm353_vm2, %v1518_v13, %v354_v57  ;;  %v584_v11 = vsub.s32 32, %v583_v22  ;;  %v586_v48 = vshll.u32 %v1644_v54, %v583_v22  ;;  %v589_v55 = vshll.u32 %v1645_v56, %v583_v22 }
  0xcc   : > { %v359_v15 = vsel %vm352_vm14, %v355_v61, %v358_v26  ;;  %v444_v32 = vmul.f32 %v443_v28, %v441_v51  ;;  %v526_v9 = vadd.s32 536870912, %v525_v14  ;;  %v592_v45 = vshll.u32 %v1646_v58, %v583_v22 }
  0xcd   : > { %v360_v42 = vsel %vm349_vm1, nan, %v359_v15  ;;  %v587_v50 = vshrl.u32 %v1645_v56, %v584_v11  ;;  %v590_v12 = vshrl.u32 %v1646_v58, %v584_v11  ;;  %v593_v4 = vshrl.u32 %v1647_v60, %v584_v11 }
  0xce   : > { %v1215_v52 = vrot.slane %v360_v42, %v1751_v5  ;;  %v445_v27 = vxor.u32 2147483648, %v444_v32  ;;  %v527_v31 = vshrl.u32 %v526_v9, 30  ;;  %v585_v6 = vshrl.u32 %v1644_v54, %v584_v11 }
  0xcf   : > { %v588_v7 = vor.u32 %v587_v50, %v586_v48  ;;  %v595_v63 = vshll.u32 %v1647_v60, %v583_v22  ;;  %v596_v46 = vshrl.u32 %v1648_v62, %v584_v11  ;;  %v591_v18 = vor.u32 %v590_v12, %v589_v55 }
  0xd0   : > { %v1244_v35 = vsel %vm1207_vm7, %v1215_v52, %v2125_v24  ;;  %v1245_v3 = vsel %vm1207_vm7, %v1215_v52, %v2223_v23  ;;  %v446_v0 = vsel %vm363_vm9, %v445_v27, %v444_v32  ;;  %v528_v8 = vshll.u32 %v527_v31, 30 }
  0xd1   : > { %1260 = vst [vmem:[%s2135_s13 + $0x10] sm:$0xff] %v1244_v35  ;;  %1261 = vst [vmem:[%s2135_s13 + $0x18] sm:$0xff] %v1245_v3  ;;  %v449_v19 = vsel %vm2265_vm10, %v1890_v44, %v446_v0  ;;  %v594_v34 = vor.u32 %v593_v4, %v592_v45  ;;  %v597_v38 = vor.u32 %v596_v46, %v595_v63  ;;  %v2339_v16 = vshll.u32 %v577_v21, 8  ;;  %v2380_v45 = vld [vmem:[#allocation2 + $0x2] sm:$0x1] }
  0xd2   : > { %1521 = vcosq.f32 %v449_v19  ;;  %v2335_v37 = vsub.s32 %v525_v14, %v528_v8  ;;  %v598_v13 = vshll.u32 %v1648_v62, %v583_v22  ;;  %v599_v25 = vshrl.u32 %v1649_v10, %v584_v11 }
  0xd3   : > { %1523 = vsinq.f32 %v449_v19  ;;  %v142_v53 = vmul.f32 %v2341_v33, %v127_v36  ;;  %vm603_vm8 = vcmp.lt.s32.totalorder %v2300_v1, 3  ;;  %vm604_vm9 = vcmp.lt.s32.totalorder %v2300_v1, 4 }
  0xd4   : > { %v531_v20 = vsub.s32 0, %v2335_v37  ;;  %v600_v28 = vor.u32 %v599_v25, %v598_v13  ;;  %vm602_vm10 = vcmp.lt.s32.totalorder %v2300_v1, 2  ;;  %v605_v57 = vsel %vm601_vm6, %v585_v6, %v588_v7 }
  0xd5   : > { %v606_v40 = vsel %vm604_vm9, %v594_v34, 2102212464  ;;  %v609_v21 = vsel %vm601_vm6, %v588_v7, %v591_v18  ;;  %v610_v26 = vsel %vm604_vm9, %v597_v38, 920167782  ;;  %v613_v51 = vsel %vm601_vm6, %v591_v18, %v594_v34 }
  0xd6   : > { %v1371_v49 = vmin.u32 %v531_v20, %v2335_v37  ;;  %v607_v22 = vsel %vm603_vm8, %v591_v18, %v606_v40  ;;  %vm453_vm12 = vweird.f32 %v1890_v44  ;;  %vm467_vm13 = vcmp.lt.s32.totalorder %v2142_v39, 0 }
  0xd7   : > { %v611_v14 = vsel %vm603_vm8, %v594_v34, %v610_v26  ;;  %v614_v36 = vsel %vm604_vm9, %v600_v28, 1326507024  ;;  %vm2363_vm15 = vcmp.le.f32.partialorder %v465_v17, 0.7853982  ;;  %v551_v48 = vsub.s32 4, %v527_v31 }
  0xd8   : > { %v533_v11 = vclz %v1371_v49  ;;  %v612_v15 = vsel %vm602_vm10, %v609_v21, %v611_v14  ;;  %v615_v32 = vsel %vm603_vm8, %v597_v38, %v614_v36  ;;  %vm456_vm0 = vcmp.lt.s32.totalorder %v455_v41, 2 }
  0xd9   : > { %v608_v9 = vsel %vm602_vm10, %v605_v57, %v607_v22  ;;  %v616_v55 = vsel %vm602_vm10, %v613_v51, %v615_v32  ;;  %v120_v17 = vadd.s32 6, %v1748_v2  ;;  %v2383_v52 = vadd.f32 %v2380_v45, %v142_v53 }
  0xda   : > { %v1372_v42 = vadd.s32 4294967294, %v533_v11  ;;  %v2377_v50 = vmul.u32.u64.low %v2339_v16, %v616_v55  ;;  %v2378_v12 = vmul.u32.u64.high %v2339_v16, %v616_v55, %v2377_v50  ;;  %vm457_vm11 = vcmp.eq.s32.totalorder %v455_v41, 0 }
  0xdb   : > { %vm460_vm1 = vcmp.eq.s32.totalorder %v455_v41, 2  ;;  %v2386_v27 = vmul.u32.u64.low %v2339_v16, %v612_v15  ;;  %v2387_v4 = vmul.u32.u64.high %v2339_v16, %v612_v15, %v2386_v27  ;;  %v521_v6 = vadd.s32 %v2284_v29, %v2281_v47 }
  0xdc   : > { %v1522_v1 = vpop.eup %1521  ;;  %vm1373_vm14 = vcmp.lt.s32.totalorder %v1372_v42, 0  ;;  %v552_v7 = vsel %vm467_vm13, %v551_v48, %v527_v31  ;;  %v624_v63 = vmul.u32 %v2339_v16, %v608_v9  ;;  %v676_v0 = vand.u32 2139095040, %v2383_v52 }
  0xdd   : > { %v1524_v46 = vpop.eup %1523  ;;  %v461_v35 = vxor.u32 2147483648, %v1522_v1  ;;  %v536_v3 = vsel %vm1373_vm14, 0, %v1372_v42  ;;  %v128_v8 = vcvt.s32.f32 %v120_v17  ;;  %vm626_vm2 = vc.u32 %v2378_v12, %v2386_v27 }
  0xde   : > { %v458_v19 = vxor.u32 2147483648, %v1524_v46  ;;  %v537_v18 = vsub.s32 32, %v536_v3  ;;  %v538_v34 = vshll.u32 %v2335_v37, %v536_v3  ;;  %v541_v38 = vsub.s32 4294967266, %v536_v3 }
  0xdf   : > { %v462_v13 = vsel %vm460_vm1, %v461_v35, %v1524_v46  ;;  %v627_v47 = vadd.s32 1, %v2387_v4  ;;  %v673_v29 = vand.u32 2147483647, %v2383_v52  ;;  %v121_v53 = vadd.s32 7, %v1748_v2 }
  0xe0   : > { %v459_v31 = vsel %vm457_vm11, %v1522_v1, %v458_v19  ;;  %v539_v25 = vshrl.u32 %v521_v6, %v537_v18  ;;  %v542_v16 = vadd.s32 127, %v541_v38  ;;  %v554_v37 = vsel %vm2363_vm15, 0, %v552_v7 }
  0xe1   : > { %v463_v20 = vsel %vm456_vm0, %v459_v31, %v462_v13  ;;  %v628_v28 = vsel %vm626_vm2, %v627_v47, %v2387_v4  ;;  %v677_v57 = vshrl.u32 %v676_v0, 23  ;;  %v680_v2 = vand.u32 8388607, %v673_v29 }
  0xe2   : > { %v464_v40 = vsel %vm453_vm12, nan, %v463_v20  ;;  %v540_v21 = vor.u32 %v539_v25, %v538_v34  ;;  %v543_v49 = vshll.u32 %v542_v16, 23  ;;  %v629_v22 = vadd.s32 %v628_v28, %v624_v63 }
  0xe3   : > { %v1219_v26 = vrot.slane %v464_v40, %v1751_v5  ;;  %v1378_v51 = vadd.s32 4294967169, %v677_v57  ;;  %v143_v41 = vmul.f32 %v2341_v33, %v128_v8  ;;  %v558_v9 = vadd.s32 3, %v554_v37 }
  0xe4   : > { %v544_v14 = vor.u32 4788187, %v543_v49  ;;  %v547_v36 = vcvt.s32.f32 %v540_v21  ;;  %v630_v11 = vadd.s32 536870912, %v629_v22  ;;  %v681_v17 = vor.u32 8388608, %v680_v2 }
  0xe5   : > { %v1246_v44 = vsel %vm1207_vm7, %v1219_v26, %v2125_v24  ;;  %v1247_v48 = vsel %vm1207_vm7, %v1219_v26, %v2223_v23  ;;  %v683_v15 = vadd.s32 1, %v1378_v51  ;;  %v2423_v42 = vadd.f32 %v2380_v45, %v143_v41 }
  0xe6   : > { %1262 = vst [vmem:[%s2135_s13 + $0x20] sm:$0xff] %v1246_v44  ;;  %1263 = vst [vmem:[%s2135_s13 + $0x28] sm:$0xff] %v1247_v48  ;;  %v545_v32 = vand.u32 2147483647, %v544_v14  ;;  %v2420_v55 = vshrl.u32 %v630_v11, 30  ;;  %v129_v50 = vcvt.s32.f32 %v121_v53  ;;  %v2426_v46 = vand.u32 3, %v558_v9 }
  0xe7   : > { %vm684_vm3 = vcmp.gt.s32.totalorder %v683_v15, 0  ;;  %v625_v35 = vadd.s32 %v2386_v27, %v2378_v12  ;;  %v2431_v8 = vshll.u32 %v681_v17, 8  ;;  %v780_v19 = vand.u32 2139095040, %v2423_v42 }
  0xe8   : > { %v548_v4 = vmul.f32 %v547_v36, %v545_v32  ;;  %v632_v1 = vshll.u32 %v2420_v55, 30  ;;  %v685_v6 = vsel %vm684_vm3, %v683_v15, 0  ;;  %v2435_v18 = vmul.f32 %v2341_v33, %v129_v50 }
  0xe9   : > { %v687_v7 = vand.u32 31, %v685_v6  ;;  %vm571_vm4 = vcmp.lt.s32.totalorder %v2186_v43, 0  ;;  %v686_v16 = vshrl.u32 %v685_v6, 5  ;;  %v655_v20 = vsub.s32 4, %v2420_v55 }
  0xea   : > { %v549_v63 = vxor.u32 2147483648, %v548_v4  ;;  %v2429_v3 = vsub.s32 %v629_v22, %v632_v1  ;;  %v777_v37 = vand.u32 2147483647, %v2423_v42  ;;  %vm564_vm5 = vcmp.eq.s32.totalorder %v2426_v46, 2 }
  0xeb   : > { %v688_v0 = vsub.s32 32, %v687_v7  ;;  %v690_v13 = vshll.u32 %v1644_v54, %v687_v7  ;;  %v693_v47 = vshll.u32 %v1645_v56, %v687_v7  ;;  %v696_v33 = vshll.u32 %v1646_v58, %v687_v7 }
  0xec   : > { %v550_v34 = vsel %vm467_vm13, %v549_v63, %v548_v4  ;;  %v635_v38 = vsub.s32 0, %v2429_v3  ;;  %v699_v61 = vshll.u32 %v1647_v60, %v687_v7  ;;  %vm561_vm6 = vcmp.eq.s32.totalorder %v2426_v46, 0 }
  0xed   : > { %v553_v12 = vsel %vm2363_vm15, %v2142_v39, %v550_v34  ;;  %v691_v27 = vshrl.u32 %v1645_v56, %v688_v0  ;;  %v694_v31 = vshrl.u32 %v1646_v58, %v688_v0  ;;  %v697_v53 = vshrl.u32 %v1647_v60, %v688_v0 }
  0xee   : > { %1525 = vcosq.f32 %v553_v12  ;;  %v1375_v25 = vmin.u32 %v635_v38, %v2429_v3  ;;  %v689_v57 = vshrl.u32 %v1644_v54, %v688_v0  ;;  %v700_v22 = vshrl.u32 %v1648_v62, %v688_v0 }
  0xef   : > { %1527 = vsinq.f32 %v553_v12  ;;  %v692_v40 = vor.u32 %v691_v27, %v690_v13  ;;  %v695_v21 = vor.u32 %v694_v31, %v693_v47  ;;  %v698_v49 = vor.u32 %v697_v53, %v696_v33 }
  0xf0   : > { %v637_v28 = vclz %v1375_v25  ;;  %v702_v26 = vshll.u32 %v1648_v62, %v687_v7  ;;  %v703_v51 = vshrl.u32 %v1649_v10, %v688_v0  ;;  %vm560_vm8 = vcmp.lt.s32.totalorder %v2426_v46, 2 }
  0xf1   : > { %vm705_vm9 = vcmp.lt.s32.totalorder %v686_v16, 1  ;;  %vm706_vm10 = vcmp.lt.s32.totalorder %v686_v16, 2  ;;  %v781_v41 = vshrl.u32 %v780_v19, 23  ;;  %vm557_vm12 = vweird.f32 %v2142_v39 }
  0xf2   : > { %v1376_v2 = vadd.s32 4294967294, %v637_v28  ;;  %v701_v14 = vor.u32 %v700_v22, %v699_v61  ;;  %v704_v36 = vor.u32 %v703_v51, %v702_v26  ;;  %vm707_vm13 = vcmp.lt.s32.totalorder %v686_v16, 3 }
  0xf3   : > { %vm708_vm15 = vcmp.lt.s32.totalorder %v686_v16, 4  ;;  %vm2464_vm0 = vcmp.le.f32.partialorder %v569_v59, 0.7853982  ;;  %v709_v44 = vsel %vm705_vm9, %v689_v57, %v692_v40  ;;  %v713_v15 = vsel %vm705_vm9, %v692_v40, %v695_v21 }
  0xf4   : > { %vm1377_vm11 = vcmp.lt.s32.totalorder %v1376_v2, 0  ;;  %v710_v48 = vsel %vm708_vm15, %v698_v49, 2102212464  ;;  %v714_v9 = vsel %vm708_vm15, %v701_v14, 920167782  ;;  %v717_v17 = vsel %vm705_vm9, %v695_v21, %v698_v49 }
  0xf5   : > { %v640_v32 = vsel %vm1377_vm11, 0, %v1376_v2  ;;  %v718_v50 = vsel %vm708_vm15, %v704_v36, 1326507024  ;;  %v711_v7 = vsel %vm707_vm13, %v695_v21, %v710_v48  ;;  %v2473_v59 = vsel %vm571_vm4, %v655_v20, %v2420_v55 }
  0xf6   : > { %v641_v4 = vsub.s32 32, %v640_v32  ;;  %v642_v1 = vshll.u32 %v2429_v3, %v640_v32  ;;  %v645_v6 = vsub.s32 4294967266, %v640_v32  ;;  %v715_v63 = vsel %vm707_vm13, %v698_v49, %v714_v9 }
  0xf7   : > { %v719_v0 = vsel %vm707_vm13, %v701_v14, %v718_v50  ;;  %v1382_v19 = vadd.s32 4294967169, %v781_v41  ;;  %v716_v47 = vsel %vm706_vm10, %v713_v15, %v715_v63  ;;  %v712_v31 = vsel %vm706_vm10, %v709_v44, %v711_v7 }
  0xf8   : > { %v1526_v34 = vpop.eup %1525  ;;  %v643_v38 = vshrl.u32 %v625_v35, %v641_v4  ;;  %v646_v13 = vadd.s32 127, %v645_v6  ;;  %v720_v3 = vsel %vm706_vm10, %v717_v17, %v719_v0  ;;  %v784_v16 = vand.u32 8388607, %v777_v37 }
  0xf9   : > { %v1528_v12 = vpop.eup %1527  ;;  %v565_v27 = vxor.u32 2147483648, %v1526_v34  ;;  %v2481_v33 = vmul.u32.u64.low %v2431_v8, %v720_v3  ;;  %v2482_v55 = vmul.u32.u64.high %v2431_v8, %v720_v3, %v2481_v33  ;;  %v787_v61 = vadd.s32 1, %v1382_v19 }
  0xfa   : > { %v562_v25 = vxor.u32 2147483648, %v1528_v12  ;;  %v644_v53 = vor.u32 %v643_v38, %v642_v1  ;;  %v647_v20 = vshll.u32 %v646_v13, 23  ;;  %v658_v26 = vsel %vm2464_vm0, 0, %v2473_v59 }
  0xfb   : > { %v566_v35 = vsel %vm564_vm5, %v565_v27, %v1528_v12  ;;  %v2487_v28 = vmul.u32.u64.low %v2431_v8, %v716_v47  ;;  %v2488_v57 = vmul.u32.u64.high %v2431_v8, %v716_v47, %v2487_v28  ;;  %vm788_vm1 = vcmp.gt.s32.totalorder %v787_v61, 0 }
  0xfc   : > { %v563_v40 = vsel %vm561_vm6, %v1526_v34, %v562_v25  ;;  %v648_v21 = vor.u32 4788187, %v647_v20  ;;  %v651_v49 = vcvt.s32.f32 %v644_v53  ;;  %v728_v51 = vmul.u32 %v2431_v8, %v712_v31 }
  0xfd   : > { %v567_v22 = vsel %vm560_vm8, %v563_v40, %v566_v35  ;;  %v789_v2 = vsel %vm788_vm1, %v787_v61, 0  ;;  %vm730_vm14 = vc.u32 %v2482_v55, %v2487_v28  ;;  %v731_v44 = vadd.s32 1, %v2488_v57 }
  0xfe   : > { %v568_v41 = vsel %vm557_vm12, nan, %v567_v22  ;;  %v649_v14 = vand.u32 2147483647, %v648_v21  ;;  %v791_v36 = vand.u32 31, %v789_v2  ;;  %v785_v48 = vor.u32 8388608, %v784_v16 }
  0xff   : > { %v1223_v46 = vrot.slane %v568_v41, %v1751_v5  ;;  %v790_v15 = vshrl.u32 %v789_v2, 5  ;;  %v732_v4 = vsel %vm730_vm14, %v731_v44, %v2488_v57  ;;  %v662_v61 = vadd.s32 3, %v658_v26 }
 0x100   : > { %v652_v32 = vmul.f32 %v651_v49, %v649_v14  ;;  %v792_v9 = vsub.s32 32, %v791_v36  ;;  %v794_v8 = vshll.u32 %v1644_v54, %v791_v36  ;;  %v797_v39 = vshll.u32 %v1645_v56, %v791_v36 }
 0x101   : > { %v1248_v17 = vsel %vm1207_vm7, %v1223_v46, %v2125_v24  ;;  %v1249_v50 = vsel %vm1207_vm7, %v1223_v46, %v2223_v23  ;;  %v800_v1 = vshll.u32 %v1646_v58, %v791_v36  ;;  %v733_v7 = vadd.s32 %v732_v4, %v728_v51 }
 0x102   : > { %1264 = vst [vmem:[%s2135_s13 + $0x30] sm:$0xff] %v1248_v17  ;;  %1265 = vst [vmem:[%s2135_s13 + $0x38] sm:$0xff] %v1249_v50  ;;  %v653_v6 = vxor.u32 2147483648, %v652_v32  ;;  %v793_v59 = vshrl.u32 %v1644_v54, %v792_v9  ;;  %v795_v63 = vshrl.u32 %v1645_v56, %v792_v9  ;;  %v798_v0 = vshrl.u32 %v1646_v58, %v792_v9 }
 0x103   : > { %v801_v19 = vshrl.u32 %v1647_v60, %v792_v9  ;;  %v803_v34 = vshll.u32 %v1647_v60, %v791_v36  ;;  %v804_v38 = vshrl.u32 %v1648_v62, %v792_v9  ;;  %v734_v47 = vadd.s32 536870912, %v733_v7 }
 0x104   : > { %v654_v13 = vsel %vm571_vm4, %v653_v6, %v652_v32  ;;  %v796_v3 = vor.u32 %v795_v63, %v794_v8  ;;  %v806_v12 = vshll.u32 %v1648_v62, %v791_v36  ;;  %v799_v31 = vor.u32 %v798_v0, %v797_v39 }
 0x105   : > { %v657_v27 = vsel %vm2464_vm0, %v2186_v43, %v654_v13  ;;  %v802_v33 = vor.u32 %v801_v19, %v800_v1  ;;  %v805_v25 = vor.u32 %v804_v38, %v803_v34  ;;  %v735_v53 = vshrl.u32 %v734_v47, 30 }
 0x106   : > { %1529 = vcosq.f32 %v657_v27  ;;  %v807_v20 = vshrl.u32 %v1649_v10, %v792_v9  ;;  %vm809_vm2 = vcmp.lt.s32.totalorder %v790_v15, 1  ;;  %vm811_vm3 = vcmp.lt.s32.totalorder %v790_v15, 3 }
 0x107   : > { %1531 = vsinq.f32 %v657_v27  ;;  %vm812_vm4 = vcmp.lt.s32.totalorder %v790_v15, 4  ;;  %v736_v35 = vshll.u32 %v735_v53, 30  ;;  %vm810_vm5 = vcmp.lt.s32.totalorder %v790_v15, 2 }
 0x108   : > { %v808_v57 = vor.u32 %v807_v20, %v806_v12  ;;  %v825_v16 = vshll.u32 %v785_v48, 8  ;;  %v813_v40 = vsel %vm809_vm2, %v793_v59, %v796_v3  ;;  %v814_v11 = vsel %vm812_vm4, %v802_v33, 2102212464 }
 0x109   : > { %v817_v21 = vsel %vm809_vm2, %v796_v3, %v799_v31  ;;  %v818_v49 = vsel %vm812_vm4, %v805_v25, 920167782  ;;  %v2534_v22 = vsub.s32 %v733_v7, %v736_v35  ;;  %v815_v51 = vsel %vm811_vm3, %v799_v31, %v814_v11 }
 0x10a   : > { %v819_v2 = vsel %vm811_vm3, %v802_v33, %v818_v49  ;;  %v821_v26 = vsel %vm809_vm2, %v799_v31, %v802_v33  ;;  %v822_v14 = vsel %vm812_vm4, %v808_v57, 1326507024  ;;  %v2542_v36 = vadd.f32 %v2380_v45, %v2435_v18 }
 0x10b   : > { %v820_v41 = vsel %vm810_vm5, %v817_v21, %v819_v2  ;;  %v663_v46 = vand.u32 3, %v662_v61  ;;  %v739_v44 = vsub.s32 0, %v2534_v22  ;;  %v823_v48 = vsel %vm811_vm3, %v805_v25, %v822_v14 }
 0x10c   : > { %v816_v32 = vsel %vm810_vm5, %v813_v40, %v815_v51  ;;  %v824_v9 = vsel %vm810_vm5, %v821_v26, %v823_v48  ;;  %v2548_v8 = vmul.u32.u64.low %v825_v16, %v820_v41  ;;  %v2549_v39 = vmul.u32.u64.high %v825_v16, %v820_v41, %v2548_v8 }
 0x10d   : > { %v1379_v17 = vmin.u32 %v739_v44, %v2534_v22  ;;  %v2553_v50 = vmul.u32.u64.low %v825_v16, %v824_v9  ;;  %v2554_v4 = vmul.u32.u64.high %v825_v16, %v824_v9, %v2553_v50  ;;  %vm661_vm6 = vweird.f32 %v2186_v43 }
 0x10e   : > { %vm675_vm8 = vcmp.lt.s32.totalorder %v2383_v52, 0  ;;  %v884_v45 = vand.u32 2139095040, %v2542_v36  ;;  %vm665_vm9 = vcmp.eq.s32.totalorder %v663_v46, 0  ;;  %vm668_vm10 = vcmp.eq.s32.totalorder %v663_v46, 2 }
 0x10f   : > { %v741_v15 = vclz %v1379_v17  ;;  %v832_v1 = vmul.u32 %v825_v16, %v816_v32  ;;  %v759_v59 = vsub.s32 4, %v735_v53  ;;  %v835_v63 = vadd.s32 1, %v2549_v39 }
 0x110   : > { %v1530_v18 = vpop.eup %1529  ;;  %v885_v0 = vshrl.u32 %v884_v45, 23  ;;  %vm664_vm12 = vcmp.lt.s32.totalorder %v663_v46, 2  ;;  %vm834_vm13 = vc.u32 %v2554_v4, %v2548_v8  ;;  %v729_v13 = vadd.s32 %v2487_v28, %v2482_v55 }
 0x111   : > { %v1532_v6 = vpop.eup %1531  ;;  %v669_v7 = vxor.u32 2147483648, %v1530_v18  ;;  %v1380_v34 = vadd.s32 4294967294, %v741_v15  ;;  %v836_v47 = vsel %vm834_vm13, %v835_v63, %v2549_v39  ;;  %v881_v31 = vand.u32 2147483647, %v2542_v36 }
 0x112   : > { %v666_v19 = vxor.u32 2147483648, %v1532_v6  ;;  %v1386_v3 = vadd.s32 4294967169, %v885_v0  ;;  %v837_v27 = vadd.s32 %v836_v47, %v832_v1  ;;  %v760_v20 = vsel %vm675_vm8, %v759_v59, %v735_v53 }
 0x113   : > { %v670_v38 = vsel %vm668_vm10, %v669_v7, %v1532_v6  ;;  %vm1381_vm15 = vcmp.lt.s32.totalorder %v1380_v34, 0  ;;  %vm2575_vm11 = vcmp.le.f32.partialorder %v673_v29, 0.7853982  ;;  %v888_v41 = vand.u32 8388607, %v881_v31 }
 0x114   : > { %v667_v12 = vsel %vm665_vm9, %v1530_v18, %v666_v19  ;;  %v744_v25 = vsel %vm1381_vm15, 0, %v1380_v34  ;;  %v891_v61 = vadd.s32 1, %v1386_v3  ;;  %v838_v40 = vadd.s32 536870912, %v837_v27 }
 0x115   : > { %v671_v33 = vsel %vm664_vm12, %v667_v12, %v670_v38  ;;  %v745_v55 = vsub.s32 32, %v744_v25  ;;  %v746_v28 = vshll.u32 %v2534_v22, %v744_v25  ;;  %v749_v57 = vsub.s32 4294967266, %v744_v25 }
 0x116   : > { %v672_v35 = vsel %vm661_vm6, nan, %v671_v33  ;;  %vm892_vm0 = vcmp.gt.s32.totalorder %v891_v61, 0  ;;  %v762_v51 = vsel %vm2575_vm11, 0, %v760_v20  ;;  %v2587_v2 = vshrl.u32 %v838_v40, 30 }
 0x117   : > { %v1227_v16 = vrot.slane %v672_v35, %v1751_v5  ;;  %v747_v53 = vshrl.u32 %v729_v13, %v745_v55  ;;  %v750_v21 = vadd.s32 127, %v749_v57  ;;  %v893_v43 = vsel %vm892_vm0, %v891_v61, 0 }
 0x118   : > { %v895_v14 = vand.u32 31, %v893_v43  ;;  %v840_v46 = vshll.u32 %v2587_v2, 30  ;;  %v766_v9 = vadd.s32 3, %v762_v51  ;;  %v889_v18 = vor.u32 8388608, %v888_v41 }
 0x119   : > { %v1250_v49 = vsel %vm1207_vm7, %v1227_v16, %v2125_v24  ;;  %v1251_v22 = vsel %vm1207_vm7, %v1227_v16, %v2223_v23  ;;  %v748_v29 = vor.u32 %v747_v53, %v746_v28  ;;  %v751_v26 = vshll.u32 %v750_v21, 23 }
 0x11a   : > { %1266 = vst [vmem:[%s2135_s13 + $0x40] sm:$0xff] %v1250_v49  ;;  %1267 = vst [vmem:[%s2135_s13 + $0x48] sm:$0xff] %v1251_v22  ;;  %v896_v32 = vsub.s32 32, %v895_v14  ;;  %v841_v39 = vsub.s32 %v837_v27, %v840_v46  ;;  %v898_v17 = vshll.u32 %v1644_v54, %v895_v14  ;;  %v901_v50 = vshll.u32 %v1645_v56, %v895_v14 }
 0x11b   : > { %v752_v44 = vor.u32 4788187, %v751_v26  ;;  %v755_v48 = vcvt.s32.f32 %v748_v29  ;;  %v894_v15 = vshrl.u32 %v893_v43, 5  ;;  %v904_v59 = vshll.u32 %v1646_v58, %v895_v14 }
 0x11c   : > { %v899_v1 = vshrl.u32 %v1645_v56, %v896_v32  ;;  %v843_v6 = vsub.s32 0, %v841_v39  ;;  %v902_v7 = vshrl.u32 %v1646_v58, %v896_v32  ;;  %v905_v63 = vshrl.u32 %v1647_v60, %v896_v32 }
 0x11d   : > { %v753_v45 = vand.u32 2147483647, %v752_v44  ;;  %v833_v19 = vadd.s32 %v2548_v8, %v2554_v4  ;;  %v907_v34 = vshll.u32 %v1647_v60, %v895_v14  ;;  %v908_v38 = vshrl.u32 %v1648_v62, %v896_v32 }
 0x11e   : > { %v1383_v13 = vmin.u32 %v843_v6, %v841_v39  ;;  %v897_v47 = vshrl.u32 %v1644_v54, %v896_v32  ;;  %v900_v3 = vor.u32 %v899_v1, %v898_v17  ;;  %v903_v56 = vor.u32 %v902_v7, %v901_v50 }
 0x11f   : > { %v756_v0 = vmul.f32 %v755_v48, %v753_v45  ;;  %v909_v27 = vor.u32 %v908_v38, %v907_v34  ;;  %v910_v33 = vshll.u32 %v1648_v62, %v895_v14  ;;  %v911_v58 = vshrl.u32 %v1649_v10, %v896_v32 }
 0x120   : > { %v845_v25 = vclz %v1383_v13  ;;  %v906_v20 = vor.u32 %v905_v63, %v904_v59  ;;  %vm913_vm1 = vcmp.lt.s32.totalorder %v894_v15, 1  ;;  %v929_v61 = vshll.u32 %v889_v18, 8 }
 0x121   : > { %v757_v12 = vxor.u32 2147483648, %v756_v0  ;;  %v912_v8 = vor.u32 %v911_v58, %v910_v33  ;;  %vm915_vm14 = vcmp.lt.s32.totalorder %v894_v15, 3  ;;  %vm916_vm2 = vcmp.lt.s32.totalorder %v894_v15, 4 }
 0x122   : > { %v1384_v4 = vadd.s32 4294967294, %v845_v25  ;;  %vm914_vm3 = vcmp.lt.s32.totalorder %v894_v15, 2  ;;  %v918_v62 = vsel %vm916_vm2, %v906_v20, 2102212464  ;;  %v917_v10 = vsel %vm913_vm1, %v897_v47, %v900_v3 }
 0x123   : > { %v758_v60 = vsel %vm675_vm8, %v757_v12, %v756_v0  ;;  %v921_v35 = vsel %vm913_vm1, %v900_v3, %v903_v56  ;;  %v922_v55 = vsel %vm916_vm2, %v909_v27, 920167782  ;;  %v919_v28 = vsel %vm915_vm14, %v903_v56, %v918_v62 }
 0x124   : > { %v761_v54 = vsel %vm2575_vm11, %v2383_v52, %v758_v60  ;;  %vm1385_vm4 = vcmp.lt.s32.totalorder %v1384_v4, 0  ;;  %v923_v57 = vsel %vm915_vm14, %v906_v20, %v922_v55  ;;  %v925_v11 = vsel %vm913_vm1, %v903_v56, %v906_v20 }
 0x125   : > { %1533 = vcosq.f32 %v761_v54  ;;  %v848_v16 = vsel %vm1385_vm4, 0, %v1384_v4  ;;  %v924_v40 = vsel %vm914_vm3, %v921_v35, %v923_v57  ;;  %v926_v53 = vsel %vm916_vm2, %v912_v8, 1326507024 }
 0x126   : > { %1535 = vsinq.f32 %v761_v54  ;;  %v849_v21 = vsub.s32 32, %v848_v16  ;;  %v850_v43 = vshll.u32 %v841_v39, %v848_v16  ;;  %v853_v49 = vsub.s32 4294967266, %v848_v16 }
 0x127   : > { %v927_v22 = vsel %vm915_vm14, %v909_v27, %v926_v53  ;;  %v920_v51 = vsel %vm914_vm3, %v917_v10, %v919_v28  ;;  %v2624_v26 = vmul.u32.u64.low %v929_v61, %v924_v40  ;;  %v2625_v41 = vmul.u32.u64.high %v929_v61, %v924_v40, %v2624_v26 }
 0x128   : > { %v928_v29 = vsel %vm914_vm3, %v925_v11, %v927_v22  ;;  %v851_v14 = vshrl.u32 %v833_v19, %v849_v21  ;;  %v854_v46 = vadd.s32 127, %v853_v49  ;;  %v767_v32 = vand.u32 3, %v766_v9 }
 0x129   : > { %v2627_v44 = vmul.u32.u64.low %v929_v61, %v928_v29  ;;  %v2628_v48 = vmul.u32.u64.high %v929_v61, %v928_v29, %v2627_v44  ;;  %v936_v45 = vmul.u32 %v929_v61, %v920_v51  ;;  %v939_v39 = vadd.s32 1, %v2625_v41 }
 0x12a   : > { %v852_v17 = vor.u32 %v851_v14, %v850_v43  ;;  %v855_v50 = vshll.u32 %v854_v46, 23  ;;  %vm769_vm6 = vcmp.eq.s32.totalorder %v767_v32, 0  ;;  %vm772_vm8 = vcmp.eq.s32.totalorder %v767_v32, 2 }
 0x12b   : > { %vm938_vm5 = vc.u32 %v2628_v48, %v2624_v26  ;;  %v863_v0 = vsub.s32 4, %v2587_v2  ;;  %vm768_vm9 = vcmp.lt.s32.totalorder %v767_v32, 2  ;;  %vm765_vm10 = vweird.f32 %v2383_v52 }
 0x12c   : > { %v856_v18 = vor.u32 4788187, %v855_v50  ;;  %v859_v1 = vcvt.s32.f32 %v852_v17  ;;  %v940_v6 = vsel %vm938_vm5, %v939_v39, %v2625_v41  ;;  %vm2637_vm12 = vcmp.le.f32.partialorder %v777_v37, 0.7853982 }
 0x12d   : > { %v941_v9 = vadd.s32 %v940_v6, %v936_v45  ;;  %vm779_vm13 = vcmp.lt.s32.totalorder %v2423_v42, 0  ;;  %v937_v57 = vadd.s32 %v2624_v26, %v2628_v48  ;;  %vm869_vm14 = vweird.f32 %v2423_v42 }
 0x12e   : > { %v857_v63 = vand.u32 2147483647, %v856_v18  ;;  %v864_v27 = vsel %vm779_vm13, %v863_v0, %v2587_v2  ;;  %vm883_vm2 = vcmp.lt.s32.totalorder %v2542_v36, 0  ;;  %vm882_vm3 = vcmp.le.f32.partialorder %v881_v31, 0.7853982 }
 0x12f   : > { %v1534_v15 = vpop.eup %1533  ;;  %v942_v13 = vadd.s32 536870912, %v941_v9  ;;  %v866_v61 = vsel %vm2637_vm12, 0, %v864_v27 }
 0x130   : > { %v1536_v7 = vpop.eup %1535  ;;  %v773_v59 = vxor.u32 2147483648, %v1534_v15  ;;  %v860_v38 = vmul.f32 %v859_v1, %v857_v63  ;;  %v870_v54 = vadd.s32 3, %v866_v61 }
 0x131   : > { %v770_v19 = vxor.u32 2147483648, %v1536_v7  ;;  %v943_v33 = vshrl.u32 %v942_v13, 30 }
 0x132   : > { %v774_v34 = vsel %vm772_vm8, %v773_v59, %v1536_v7  ;;  %v861_v12 = vxor.u32 2147483648, %v860_v38  ;;  %v871_v10 = vand.u32 3, %v870_v54  ;;  %vm973_vm8 = vweird.f32 %v2542_v36 }
 0x133   : > { %v771_v47 = vsel %vm769_vm6, %v1534_v15, %v770_v19  ;;  %v944_v20 = vshll.u32 %v943_v33, 30  ;;  %v967_v39 = vsub.s32 4, %v943_v33 }
 0x134   : > { %v775_v56 = vsel %vm768_vm9, %v771_v47, %v774_v34  ;;  %v862_v25 = vsel %vm779_vm13, %v861_v12, %v860_v38  ;;  %vm876_vm15 = vcmp.eq.s32.totalorder %v871_v10, 2  ;;  %vm872_vm11 = vcmp.lt.s32.totalorder %v871_v10, 2 }
 0x135   : > { %v776_v52 = vsel %vm765_vm10, nan, %v775_v56  ;;  %v865_v37 = vsel %vm2637_vm12, %v2423_v42, %v862_v25  ;;  %v945_v8 = vsub.s32 %v941_v9, %v944_v20  ;;  %vm873_vm1 = vcmp.eq.s32.totalorder %v871_v10, 0 }
 0x136   : > { %v1231_v58 = vrot.slane %v776_v52, %v1751_v5  ;;  %1537 = vcosq.f32 %v865_v37  ;;  %v968_v15 = vsel %vm883_vm2, %v967_v39, %v943_v33 }
 0x137   : > { %1539 = vsinq.f32 %v865_v37  ;;  %v947_v4 = vsub.s32 0, %v945_v8  ;;  %v970_v59 = vsel %vm882_vm3, 0, %v968_v15 }
 0x138   : > { %v1252_v60 = vsel %vm1207_vm7, %v1231_v58, %v2125_v24  ;;  %v1253_v2 = vsel %vm1207_vm7, %v1231_v58, %v2223_v23  ;;  %v974_v63 = vadd.s32 3, %v970_v59 }
 0x139   : > { %1268 = vst [vmem:[%s2135_s13 + $0x50] sm:$0xff] %v1252_v60  ;;  %1269 = vst [vmem:[%s2135_s13 + $0x58] sm:$0xff] %v1253_v2  ;;  %v1387_v62 = vmin.u32 %v947_v4, %v945_v8 }
 0x13a   : > { %v975_v0 = vand.u32 3, %v974_v63 }
 0x13b   : > { %v949_v35 = vclz %v1387_v62 }
 0x13c   : > { %vm980_vm4 = vcmp.eq.s32.totalorder %v975_v0, 2  ;;  %vm977_vm5 = vcmp.eq.s32.totalorder %v975_v0, 0  ;;  %vm976_vm6 = vcmp.lt.s32.totalorder %v975_v0, 2 }
 0x13d   : > { %v1388_v55 = vadd.s32 4294967294, %v949_v35 }
 0x13f   : > { %vm1389_vm0 = vcmp.lt.s32.totalorder %v1388_v55, 0 }
 0x140   : > { %v1538_v28 = vpop.eup %1537  ;;  %v952_v11 = vsel %vm1389_vm0, 0, %v1388_v55 }
 0x141   : > { %v1540_v16 = vpop.eup %1539  ;;  %v877_v40 = vxor.u32 2147483648, %v1538_v28  ;;  %v953_v21 = vsub.s32 32, %v952_v11  ;;  %v954_v43 = vshll.u32 %v945_v8, %v952_v11  ;;  %v957_v49 = vsub.s32 4294967266, %v952_v11 }
 0x142   : > { %v874_v53 = vxor.u32 2147483648, %v1540_v16 }
 0x143   : > { %v878_v22 = vsel %vm876_vm15, %v877_v40, %v1540_v16  ;;  %v955_v29 = vshrl.u32 %v937_v57, %v953_v21  ;;  %v958_v41 = vadd.s32 127, %v957_v49 }
 0x144   : > { %v875_v51 = vsel %vm873_vm1, %v1538_v28, %v874_v53 }
 0x145   : > { %v879_v14 = vsel %vm872_vm11, %v875_v51, %v878_v22  ;;  %v956_v46 = vor.u32 %v955_v29, %v954_v43  ;;  %v959_v44 = vshll.u32 %v958_v41, 23 }
 0x146   : > { %v880_v26 = vsel %vm869_vm14, nan, %v879_v14 }
 0x147   : > { %v1235_v48 = vrot.slane %v880_v26, %v1751_v5  ;;  %v960_v32 = vor.u32 4788187, %v959_v44  ;;  %v963_v17 = vcvt.s32.f32 %v956_v46 }
 0x149   : > { %v1254_v50 = vsel %vm1207_vm7, %v1235_v48, %v2125_v24  ;;  %v1255_v42 = vsel %vm1207_vm7, %v1235_v48, %v2223_v23  ;;  %v961_v45 = vand.u32 2147483647, %v960_v32 }
 0x14a   : > { %1270 = vst [vmem:[%s2135_s13 + $0x60] sm:$0xff] %v1254_v50  ;;  %1271 = vst [vmem:[%s2135_s13 + $0x68] sm:$0xff] %v1255_v42 }
 0x14b   : > { %v964_v18 = vmul.f32 %v963_v17, %v961_v45 }
 0x14d   : > { %v965_v1 = vxor.u32 2147483648, %v964_v18 }
 0x14f   : > { %v966_v6 = vsel %vm883_vm2, %v965_v1, %v964_v18 }
 0x150   : > { %v969_v7 = vsel %vm882_vm3, %v2542_v36, %v966_v6 }
 0x151   : > { %1541 = vcosq.f32 %v969_v7 }
 0x152   : > { %1543 = vsinq.f32 %v969_v7 }
 0x15b   : > { %v1542_v9 = vpop.eup %1541 }
 0x15c   : > { %v1544_v19 = vpop.eup %1543  ;;  %v981_v34 = vxor.u32 2147483648, %v1542_v9 }
 0x15d   : > { %v978_v31 = vxor.u32 2147483648, %v1544_v19 }
 0x15e   : > { %v982_v38 = vsel %vm980_vm4, %v981_v34, %v1544_v19 }
 0x15f   : > { %v979_v13 = vsel %vm977_vm5, %v1542_v9, %v978_v31 }
 0x160   : > { %v983_v47 = vsel %vm976_vm6, %v979_v13, %v982_v38 }
 0x161   : > { %v984_v3 = vsel %vm973_vm8, nan, %v983_v47 }
 0x162   : > { %v1239_v56 = vrot.slane %v984_v3, %v1751_v5 }
 0x164   : > { %v1256_v36 = vsel %vm1207_vm7, %v1239_v56, %v2125_v24  ;;  %v1257_v12 = vsel %vm1207_vm7, %v1239_v56, %v2223_v23 }
 0x165   : > { %1272 = vst [vmem:[%s2135_s13 + $0x70] sm:$0xff] %v1256_v36  ;;  %1273 = vst [vmem:[%s2135_s13 + $0x78] sm:$0xff] %v1257_v12 }
 0x166   : > { %1588 = shalt.err (!%p1585_p4)
}
 0x167   : > { %s1589_s26 = scalar_lea.hbm %s2679_s21, 2048  ;;  %s1593_s29 = scalar_lea.hbm %s2735_s1, 4096 }
 0x168   : > { %p1590_p7 = scmp.ne.s32.totalorder %s2679_s21, %s1589_s26  ;;  %p1594_p13 = scmp.lt.u32.totalorder %s2679_s21, %s2735_s1 }
 0x169   : > { %p1595_p1 = scmp.lt.u32.totalorder %s1593_s29, %s1589_s26  ;;  %p1597_p5 = scmp.lt.u32.totalorder %s1589_s26, %s2679_s21 }
 0x16a   : > { %p1591_p8 = pnand %p1590_p7, %p2764_p6 }
 0x16b   : > { %p1596_p0 = por %p1595_p1, %p1594_p13 }
 0x16c   : > { %p1592_p11 = pneg %p1591_p8 }
 0x16d   : > { %p1598_p9 = por %p1597_p5, %p1596_p0 }
 0x16f   : > { %p1599_p10 = pnand %p1598_p9, %p1592_p11 }
 0x171   : > { %1602 = shalt.err (!%p1599_p10)
}
 0x172   : > { %s1651_s3 = smov 128   ;;  %s1652_s4 = smov 8  }
 0x173   : > { %1451 = dma.vmem_to_hbm [thread:$0]  (%p2764_p6), %s2681_s18, 2048, %s2679_s21, %s2693_s10, %s1651_s3, %s1651_s3, %s1652_s4  }
 0x174 PF: > { %p1463_p12 = scmp.ge.s32.totalorder %s1641_s9, 2  ;;  %s1304_s5 = sand.u32 1, %s1629_s6  }
 0x175   : > { %p2765_p2 = scmp.ne.s32.totalorder %s2740_s17, 0  ;;  %s1305_s11 = scalar_lea.sflag [#allocation4], %s1304_s5 }
 0x177   : > { %p1458_p3 = pnand %p1463_p12, %p2765_p2 }
 0x179   : > { %1624 = dma.done.wait (!%p1458_p3), %s1305_s11, 2048  }
 0x17a   : > { %1626 = vsyncadd (!%p1458_p3), %s1305_s11, 4294965248  ;;  %p12_p4 = scmp.ge.s32.totalorder %s1688_s12, 4   ;;  %s2766_s6 = smov %s1633_s7 }
 0x17b   : > { %s2767_s7 = smov %s1637_s8  ;;  %s2768_s8 = smov %s1699_s15 }
 0x17c   : > { %s2769_s9 = smov %s1688_s12  ;;  %14 = sbr.rel (!%p12_p4) target bundleno = 4 (0x4), region = 61 }
 0x183   :  { %1310 = vsyncpa [#allocation3], 1 }
 0x184   :  { %1312 = vsyncpa [#allocation3 + $0x1], 1 }
 0x185   :  { %1313 = vsyncpa [#allocation4], 1 }
 0x186   :  { %1315 = vsyncpa [#allocation4 + $0x1], 1 }

</bundles_post_ra>
